<compile_context>
chip_gen: v7x
topology: tpu7x:2x2x1
jax: 0.10.0
libtpu: 0.0.40
codegen_flags: <defaults>
</compile_context>

<pallas_src>
import jax
import jax.numpy as jnp
from jax import lax
from jax.experimental import pallas as pl
from jax.experimental.pallas import tpu as pltpu

BN_EPS = 1e-5


def _bn(a):
    # Per-channel training-mode batch norm over rows (rows = N*H*W), affine=False.
    # Two-pass, mean-centered (biased) variance: avoids E[x^2] - mean^2 cancellation.
    mean = jnp.mean(a, axis=0, keepdims=True)
    c = a - mean
    var = jnp.mean(c * c, axis=0, keepdims=True)
    return c * lax.rsqrt(var + BN_EPS)


def bottleneck_kernel(x_ref, inj_ref, w1_ref, w2_ref, w3_ref, out_ref):
    # x_ref:   (N, H, W, Cin)  f32, Cin == 4 * planes (residual add requires it)
    # inj_ref: (N, H, W, P)    f32, injection added after conv1
    # w1_ref:  (Cin, P)        bf16, 1x1 conv
    # w2_ref:  (9, P, P)       bf16, 3x3 conv, one (cin, cout) matrix per tap (dy, dx)
    # w3_ref:  (P, Cin)        bf16, 1x1 conv
    N, H, W, Cin = x_ref.shape
    P = w1_ref.shape[1]
    NHW = N * H * W

    # --- conv1 (1x1) + injection, bn1, relu -------------------------------
    xf = x_ref[...].reshape(NHW, Cin)
    h = jnp.dot(xf.astype(jnp.bfloat16), w1_ref[...],
                preferred_element_type=jnp.float32)
    h = h + inj_ref[...].reshape(NHW, P)
    h = jnp.maximum(_bn(h), 0.0)

    # --- conv2 (3x3, padding=1, stride=1) ----------------------------------
    # Cast the activation to bf16 ONCE (NHW*P elements), zero-pad it as a
    # value (no VMEM scratch round trip), and accumulate nine small tap
    # matmuls directly into an f32 accumulator (no (NHW, 9*P) im2col concat).
    hb = h.astype(jnp.bfloat16).reshape(N, H, W, P)
    zrow = jnp.zeros((N, 1, W, P), jnp.bfloat16)
    hp = jnp.concatenate([zrow, hb, zrow], axis=1)           # (N, H+2, W,   P)
    zcol = jnp.zeros((N, H + 2, 1, P), jnp.bfloat16)
    hp = jnp.concatenate([zcol, hp, zcol], axis=2)           # (N, H+2, W+2, P)

    acc = jnp.zeros((NHW, P), jnp.float32)
    for dy in range(3):                                      # static unroll: 9 taps
        for dx in range(3):
            tap = hp[:, dy:dy + H, dx:dx + W, :].reshape(NHW, P)
            acc = acc + jnp.dot(tap, w2_ref[dy * 3 + dx],
                                preferred_element_type=jnp.float32)
    h = jnp.maximum(_bn(acc), 0.0)

    # --- conv3 (1x1), bn3, residual add, relu ------------------------------
    h = jnp.dot(h.astype(jnp.bfloat16), w3_ref[...],
                preferred_element_type=jnp.float32)
    h = _bn(h)
    res = x_ref[...].reshape(NHW, Cin)   # re-read: x_ref is VMEM-resident, keeps live set small
    out_ref[...] = jnp.maximum(h + res, 0.0).reshape(N, H, W, Cin)


def prepare_weights(w1_pt, w2_pt, w3_pt):
    """Convert PyTorch conv weights (out, in, kh, kw) to kernel layouts.

    Returns bf16 kernel weights:
      w1_k: (Cin, P)
      w2_k: (9, P, P)   one (cin, cout) matrix per tap, row index = dy*3 + dx
      w3_k: (P, Cin)
    plus the f32 (w1, HWIO w2, w3) used by the XLA reference.
    """
    w1 = jnp.transpose(w1_pt)                      # (Cin, P)
    w2 = jnp.transpose(w2_pt, (2, 3, 1, 0))        # (3, 3, in, out)  HWIO
    w3 = jnp.transpose(w3_pt)                      # (P, Cin)
    P = w1.shape[1]
    w1_k = w1.astype(jnp.bfloat16)
    w2_k = w2.reshape(9, P, P).astype(jnp.bfloat16)
    w3_k = w3.astype(jnp.bfloat16)
    return (w1_k, w2_k, w3_k), (w1, w2, w3)


def bottleneck_forward_nhwc(x, inj, w1_k, w2_k, w3_k):
    """x: (N, H, W, Cin) f32; inj: (N, H, W, P) f32. Returns NHWC f32 output."""
    N, H, W, Cin = x.shape
    vmem = pl.BlockSpec(memory_space=pltpu.MemorySpace.VMEM)
    return pl.pallas_call(
        bottleneck_kernel,
        out_shape=jax.ShapeDtypeStruct((N, H, W, Cin), jnp.float32),
        in_specs=[vmem] * 5,
        out_specs=vmem,
        compiler_params=pltpu.CompilerParams(vmem_limit_bytes=32 * 1024 * 1024),
    )(x, inj, w1_k, w2_k, w3_k)


def reference_forward_nhwc(x, inj, w1, w2, w3):
    """Pure-JAX f32 reference (XLA convs, HIGHEST precision), NHWC in/out."""
    dn = ("NHWC", "HWIO", "NHWC")
    prec = lax.Precision.HIGHEST

    def bn(a):
        mean = jnp.mean(a, axis=(0, 1, 2), keepdims=True)
        var = jnp.mean((a - mean) ** 2, axis=(0, 1, 2), keepdims=True)
        return (a - mean) * lax.rsqrt(var + BN_EPS)

    Cin, P = w1.shape
    out = lax.conv_general_dilated(x, w1.reshape(1, 1, Cin, P), (1, 1), "VALID",
                                   dimension_numbers=dn, precision=prec) + inj
    out = jax.nn.relu(bn(out))
    out = lax.conv_general_dilated(out, w2, (1, 1), "SAME",
                                   dimension_numbers=dn, precision=prec)
    out = jax.nn.relu(bn(out))
    out = lax.conv_general_dilated(out, w3.reshape(1, 1, P, Cin), (1, 1), "VALID",
                                   dimension_numbers=dn, precision=prec)
    out = bn(out)
    return jax.nn.relu(out + x)


if __name__ == "__main__":
    # Shapes consistent with the module: Bottleneck(inplanes=128, planes=32),
    # expansion=4 -> out channels 128 == inplanes (downsample=None, stride=1).
    N, H, W = 2, 8, 8
    planes = 32
    inplanes = planes * 4  # 128

    key = jax.random.PRNGKey(0)
    kx, ki, k1, k2, k3 = jax.random.split(key, 5)

    # NHWC inputs (kept channels-last end-to-end).
    x = jax.random.normal(kx, (N, H, W, inplanes), jnp.float32)
    inj = 0.1 * jax.random.normal(ki, (N, H, W, planes), jnp.float32)

    # Deterministic synthetic weights in PyTorch conv layout (out, in, kh, kw).
    w1_pt = jax.random.normal(k1, (planes, inplanes), jnp.float32) / jnp.sqrt(inplanes)
    w2_pt = jax.random.normal(k2, (planes, planes, 3, 3), jnp.float32) / jnp.sqrt(9 * planes)
    w3_pt = jax.random.normal(k3, (planes * 4, planes), jnp.float32) / jnp.sqrt(planes)

    (w1_k, w2_k, w3_k), (w1_f32, w2_f32, w3_f32) = prepare_weights(w1_pt, w2_pt, w3_pt)

    out = bottleneck_forward_nhwc(x, inj, w1_k, w2_k, w3_k)
    out = jax.block_until_ready(out)

    ref = reference_forward_nhwc(x, inj, w1_f32, w2_f32, w3_f32)
    assert out.shape == (N, H, W, inplanes)
    # bf16 MXU operands -> slightly looser tolerance than a pure-f32 version.
    assert jnp.allclose(out, ref, rtol=5e-2, atol=1e-1), (
        "mismatch vs JAX reference: max abs err = "
        f"{float(jnp.max(jnp.abs(out - ref)))}")

    print("KERNEL_OK")
</pallas_src>

<mosaic_0001>
module attributes {stable_mosaic.version = 11 : i64} {
  func.func @bottleneck_kernel(%arg0: memref<2x8x8x128xf32, #tpu.memory_space<vmem>>, %arg1: memref<2x8x8x32xf32, #tpu.memory_space<vmem>>, %arg2: memref<128x32xbf16, #tpu.memory_space<vmem>>, %arg3: memref<9x32x32xbf16, #tpu.memory_space<vmem>>, %arg4: memref<32x128xbf16, #tpu.memory_space<vmem>>, %arg5: memref<2x8x8x128xf32, #tpu.memory_space<vmem>>) attributes {dimension_semantics = [], scalar_prefetch = 0 : i64, scratch_operands = 0 : i64, tpu.core_type = #tpu.core_type<tc>} {
    %c0 = arith.constant 0 : index
    %c0_0 = arith.constant 0 : index
    %c0_1 = arith.constant 0 : index
    %c0_2 = arith.constant 0 : index
    %0 = vector.load %arg0[%c0, %c0_0, %c0_1, %c0_2] : memref<2x8x8x128xf32, #tpu.memory_space<vmem>>, vector<2x8x8x128xf32>
    %1 = vector.shape_cast %0 : vector<2x8x8x128xf32> to vector<128x128xf32>
    %2 = arith.truncf %1 : vector<128x128xf32> to vector<128x128xbf16>
    %c0_3 = arith.constant 0 : index
    %c0_4 = arith.constant 0 : index
    %3 = vector.load %arg2[%c0_3, %c0_4] : memref<128x32xbf16, #tpu.memory_space<vmem>>, vector<128x32xbf16>
    %cst = arith.constant dense<0.000000e+00> : vector<128x32xf32>
    %4 = tpu.matmul %2, %3, %cst {dimension_numbers = #tpu.dot_dimension_numbers<[1], [0], [0], [1], [0, 0, 1, 1], [], []>} : vector<128x128xbf16>, vector<128x32xbf16>, vector<128x32xf32> -> vector<128x32xf32>
    %c0_5 = arith.constant 0 : index
    %c0_6 = arith.constant 0 : index
    %c0_7 = arith.constant 0 : index
    %c0_8 = arith.constant 0 : index
    %5 = vector.load %arg1[%c0_5, %c0_6, %c0_7, %c0_8] : memref<2x8x8x32xf32, #tpu.memory_space<vmem>>, vector<2x8x8x32xf32>
    %6 = vector.shape_cast %5 : vector<2x8x8x32xf32> to vector<128x32xf32>
    %7 = arith.addf %4, %6 : vector<128x32xf32>
    %cst_9 = arith.constant dense<0.000000e+00> : vector<32xf32>
    %8 = vector.multi_reduction <add>, %7, %cst_9 [0] : vector<128x32xf32> to vector<32xf32>
    %9 = vector.shape_cast %8 : vector<32xf32> to vector<1x32xf32>
    %cst_10 = arith.constant 1.280000e+02 : f32
    %10 = vector.broadcast %cst_10 : f32 to vector<1x32xf32>
    %11 = arith.divf %9, %10 : vector<1x32xf32>
    %12 = vector.broadcast %11 : vector<1x32xf32> to vector<128x32xf32>
    %13 = arith.subf %7, %12 : vector<128x32xf32>
    %14 = arith.mulf %13, %13 : vector<128x32xf32>
    %cst_11 = arith.constant dense<0.000000e+00> : vector<32xf32>
    %15 = vector.multi_reduction <add>, %14, %cst_11 [0] : vector<128x32xf32> to vector<32xf32>
    %16 = vector.shape_cast %15 : vector<32xf32> to vector<1x32xf32>
    %cst_12 = arith.constant 1.280000e+02 : f32
    %17 = vector.broadcast %cst_12 : f32 to vector<1x32xf32>
    %18 = arith.divf %16, %17 : vector<1x32xf32>
    %cst_13 = arith.constant 9.99999974E-6 : f32
    %19 = vector.broadcast %cst_13 : f32 to vector<1x32xf32>
    %20 = arith.addf %18, %19 : vector<1x32xf32>
    %21 = math.rsqrt %20 : vector<1x32xf32>
    %22 = vector.broadcast %21 : vector<1x32xf32> to vector<128x32xf32>
    %23 = arith.mulf %13, %22 : vector<128x32xf32>
    %cst_14 = arith.constant 0.000000e+00 : f32
    %24 = vector.broadcast %cst_14 : f32 to vector<128x32xf32>
    %25 = arith.maximumf %23, %24 : vector<128x32xf32>
    %26 = arith.truncf %25 : vector<128x32xf32> to vector<128x32xbf16>
    %27 = vector.shape_cast %26 : vector<128x32xbf16> to vector<2x8x8x32xbf16>
    %cst_15 = arith.constant 0.000000e+00 : bf16
    %28 = vector.broadcast %cst_15 : bf16 to vector<2x1x8x32xbf16>
    %29 = tpu.concatenate %28, %27, %28 in 1 : vector<2x1x8x32xbf16>, vector<2x8x8x32xbf16>, vector<2x1x8x32xbf16> -> vector<2x10x8x32xbf16>
    %cst_16 = arith.constant 0.000000e+00 : bf16
    %30 = vector.broadcast %cst_16 : bf16 to vector<2x10x1x32xbf16>
    %31 = tpu.concatenate %30, %29, %30 in 2 : vector<2x10x1x32xbf16>, vector<2x10x8x32xbf16>, vector<2x10x1x32xbf16> -> vector<2x10x10x32xbf16>
    %cst_17 = arith.constant 0.000000e+00 : f32
    %32 = vector.broadcast %cst_17 : f32 to vector<128x32xf32>
    %33 = vector.extract_strided_slice %31 {offsets = [0, 0, 0, 0], sizes = [2, 8, 8, 32], strides = [1, 1, 1, 1]} : vector<2x10x10x32xbf16> to vector<2x8x8x32xbf16>
    %34 = vector.shape_cast %33 : vector<2x8x8x32xbf16> to vector<128x32xbf16>
    %c0_18 = arith.constant 0 : index
    %c0_19 = arith.constant 0 : index
    %c0_20 = arith.constant 0 : index
    %35 = vector.load %arg3[%c0_18, %c0_19, %c0_20] : memref<9x32x32xbf16, #tpu.memory_space<vmem>>, vector<1x32x32xbf16>
    %36 = vector.shape_cast %35 : vector<1x32x32xbf16> to vector<32x32xbf16>
    %cst_21 = arith.constant dense<0.000000e+00> : vector<128x32xf32>
    %37 = tpu.matmul %34, %36, %cst_21 {dimension_numbers = #tpu.dot_dimension_numbers<[1], [0], [0], [1], [0, 0, 1, 1], [], []>} : vector<128x32xbf16>, vector<32x32xbf16>, vector<128x32xf32> -> vector<128x32xf32>
    %38 = arith.addf %32, %37 : vector<128x32xf32>
    %39 = vector.extract_strided_slice %31 {offsets = [0, 0, 1, 0], sizes = [2, 8, 8, 32], strides = [1, 1, 1, 1]} : vector<2x10x10x32xbf16> to vector<2x8x8x32xbf16>
    %40 = vector.shape_cast %39 : vector<2x8x8x32xbf16> to vector<128x32xbf16>
    %c1 = arith.constant 1 : index
    %c0_22 = arith.constant 0 : index
    %c0_23 = arith.constant 0 : index
    %41 = vector.load %arg3[%c1, %c0_22, %c0_23] : memref<9x32x32xbf16, #tpu.memory_space<vmem>>, vector<1x32x32xbf16>
    %42 = vector.shape_cast %41 : vector<1x32x32xbf16> to vector<32x32xbf16>
    %cst_24 = arith.constant dense<0.000000e+00> : vector<128x32xf32>
    %43 = tpu.matmul %40, %42, %cst_24 {dimension_numbers = #tpu.dot_dimension_numbers<[1], [0], [0], [1], [0, 0, 1, 1], [], []>} : vector<128x32xbf16>, vector<32x32xbf16>, vector<128x32xf32> -> vector<128x32xf32>
    %44 = arith.addf %38, %43 : vector<128x32xf32>
    %45 = vector.extract_strided_slice %31 {offsets = [0, 0, 2, 0], sizes = [2, 8, 8, 32], strides = [1, 1, 1, 1]} : vector<2x10x10x32xbf16> to vector<2x8x8x32xbf16>
    %46 = vector.shape_cast %45 : vector<2x8x8x32xbf16> to vector<128x32xbf16>
    %c2 = arith.constant 2 : index
    %c0_25 = arith.constant 0 : index
    %c0_26 = arith.constant 0 : index
    %47 = vector.load %arg3[%c2, %c0_25, %c0_26] : memref<9x32x32xbf16, #tpu.memory_space<vmem>>, vector<1x32x32xbf16>
    %48 = vector.shape_cast %47 : vector<1x32x32xbf16> to vector<32x32xbf16>
    %cst_27 = arith.constant dense<0.000000e+00> : vector<128x32xf32>
    %49 = tpu.matmul %46, %48, %cst_27 {dimension_numbers = #tpu.dot_dimension_numbers<[1], [0], [0], [1], [0, 0, 1, 1], [], []>} : vector<128x32xbf16>, vector<32x32xbf16>, vector<128x32xf32> -> vector<128x32xf32>
    %50 = arith.addf %44, %49 : vector<128x32xf32>
    %51 = vector.extract_strided_slice %31 {offsets = [0, 1, 0, 0], sizes = [2, 8, 8, 32], strides = [1, 1, 1, 1]} : vector<2x10x10x32xbf16> to vector<2x8x8x32xbf16>
    %52 = vector.shape_cast %51 : vector<2x8x8x32xbf16> to vector<128x32xbf16>
    %c3 = arith.constant 3 : index
    %c0_28 = arith.constant 0 : index
    %c0_29 = arith.constant 0 : index
    %53 = vector.load %arg3[%c3, %c0_28, %c0_29] : memref<9x32x32xbf16, #tpu.memory_space<vmem>>, vector<1x32x32xbf16>
    %54 = vector.shape_cast %53 : vector<1x32x32xbf16> to vector<32x32xbf16>
    %cst_30 = arith.constant dense<0.000000e+00> : vector<128x32xf32>
    %55 = tpu.matmul %52, %54, %cst_30 {dimension_numbers = #tpu.dot_dimension_numbers<[1], [0], [0], [1], [0, 0, 1, 1], [], []>} : vector<128x32xbf16>, vector<32x32xbf16>, vector<128x32xf32> -> vector<128x32xf32>
    %56 = arith.addf %50, %55 : vector<128x32xf32>
    %57 = vector.extract_strided_slice %31 {offsets = [0, 1, 1, 0], sizes = [2, 8, 8, 32], strides = [1, 1, 1, 1]} : vector<2x10x10x32xbf16> to vector<2x8x8x32xbf16>
    %58 = vector.shape_cast %57 : vector<2x8x8x32xbf16> to vector<128x32xbf16>
    %c4 = arith.constant 4 : index
    %c0_31 = arith.constant 0 : index
    %c0_32 = arith.constant 0 : index
    %59 = vector.load %arg3[%c4, %c0_31, %c0_32] : memref<9x32x32xbf16, #tpu.memory_space<vmem>>, vector<1x32x32xbf16>
    %60 = vector.shape_cast %59 : vector<1x32x32xbf16> to vector<32x32xbf16>
    %cst_33 = arith.constant dense<0.000000e+00> : vector<128x32xf32>
    %61 = tpu.matmul %58, %60, %cst_33 {dimension_numbers = #tpu.dot_dimension_numbers<[1], [0], [0], [1], [0, 0, 1, 1], [], []>} : vector<128x32xbf16>, vector<32x32xbf16>, vector<128x32xf32> -> vector<128x32xf32>
    %62 = arith.addf %56, %61 : vector<128x32xf32>
    %63 = vector.extract_strided_slice %31 {offsets = [0, 1, 2, 0], sizes = [2, 8, 8, 32], strides = [1, 1, 1, 1]} : vector<2x10x10x32xbf16> to vector<2x8x8x32xbf16>
    %64 = vector.shape_cast %63 : vector<2x8x8x32xbf16> to vector<128x32xbf16>
    %c5 = arith.constant 5 : index
    %c0_34 = arith.constant 0 : index
    %c0_35 = arith.constant 0 : index
    %65 = vector.load %arg3[%c5, %c0_34, %c0_35] : memref<9x32x32xbf16, #tpu.memory_space<vmem>>, vector<1x32x32xbf16>
    %66 = vector.shape_cast %65 : vector<1x32x32xbf16> to vector<32x32xbf16>
    %cst_36 = arith.constant dense<0.000000e+00> : vector<128x32xf32>
    %67 = tpu.matmul %64, %66, %cst_36 {dimension_numbers = #tpu.dot_dimension_numbers<[1], [0], [0], [1], [0, 0, 1, 1], [], []>} : vector<128x32xbf16>, vector<32x32xbf16>, vector<128x32xf32> -> vector<128x32xf32>
    %68 = arith.addf %62, %67 : vector<128x32xf32>
    %69 = vector.extract_strided_slice %31 {offsets = [0, 2, 0, 0], sizes = [2, 8, 8, 32], strides = [1, 1, 1, 1]} : vector<2x10x10x32xbf16> to vector<2x8x8x32xbf16>
    %70 = vector.shape_cast %69 : vector<2x8x8x32xbf16> to vector<128x32xbf16>
    %c6 = arith.constant 6 : index
    %c0_37 = arith.constant 0 : index
    %c0_38 = arith.constant 0 : index
    %71 = vector.load %arg3[%c6, %c0_37, %c0_38] : memref<9x32x32xbf16, #tpu.memory_space<vmem>>, vector<1x32x32xbf16>
    %72 = vector.shape_cast %71 : vector<1x32x32xbf16> to vector<32x32xbf16>
    %cst_39 = arith.constant dense<0.000000e+00> : vector<128x32xf32>
    %73 = tpu.matmul %70, %72, %cst_39 {dimension_numbers = #tpu.dot_dimension_numbers<[1], [0], [0], [1], [0, 0, 1, 1], [], []>} : vector<128x32xbf16>, vector<32x32xbf16>, vector<128x32xf32> -> vector<128x32xf32>
    %74 = arith.addf %68, %73 : vector<128x32xf32>
    %75 = vector.extract_strided_slice %31 {offsets = [0, 2, 1, 0], sizes = [2, 8, 8, 32], strides = [1, 1, 1, 1]} : vector<2x10x10x32xbf16> to vector<2x8x8x32xbf16>
    %76 = vector.shape_cast %75 : vector<2x8x8x32xbf16> to vector<128x32xbf16>
    %c7 = arith.constant 7 : index
    %c0_40 = arith.constant 0 : index
    %c0_41 = arith.constant 0 : index
    %77 = vector.load %arg3[%c7, %c0_40, %c0_41] : memref<9x32x32xbf16, #tpu.memory_space<vmem>>, vector<1x32x32xbf16>
    %78 = vector.shape_cast %77 : vector<1x32x32xbf16> to vector<32x32xbf16>
    %cst_42 = arith.constant dense<0.000000e+00> : vector<128x32xf32>
    %79 = tpu.matmul %76, %78, %cst_42 {dimension_numbers = #tpu.dot_dimension_numbers<[1], [0], [0], [1], [0, 0, 1, 1], [], []>} : vector<128x32xbf16>, vector<32x32xbf16>, vector<128x32xf32> -> vector<128x32xf32>
    %80 = arith.addf %74, %79 : vector<128x32xf32>
    %81 = vector.extract_strided_slice %31 {offsets = [0, 2, 2, 0], sizes = [2, 8, 8, 32], strides = [1, 1, 1, 1]} : vector<2x10x10x32xbf16> to vector<2x8x8x32xbf16>
    %82 = vector.shape_cast %81 : vector<2x8x8x32xbf16> to vector<128x32xbf16>
    %c8 = arith.constant 8 : index
    %c0_43 = arith.constant 0 : index
    %c0_44 = arith.constant 0 : index
    %83 = vector.load %arg3[%c8, %c0_43, %c0_44] : memref<9x32x32xbf16, #tpu.memory_space<vmem>>, vector<1x32x32xbf16>
    %84 = vector.shape_cast %83 : vector<1x32x32xbf16> to vector<32x32xbf16>
    %cst_45 = arith.constant dense<0.000000e+00> : vector<128x32xf32>
    %85 = tpu.matmul %82, %84, %cst_45 {dimension_numbers = #tpu.dot_dimension_numbers<[1], [0], [0], [1], [0, 0, 1, 1], [], []>} : vector<128x32xbf16>, vector<32x32xbf16>, vector<128x32xf32> -> vector<128x32xf32>
    %86 = arith.addf %80, %85 : vector<128x32xf32>
    %cst_46 = arith.constant dense<0.000000e+00> : vector<32xf32>
    %87 = vector.multi_reduction <add>, %86, %cst_46 [0] : vector<128x32xf32> to vector<32xf32>
    %88 = vector.shape_cast %87 : vector<32xf32> to vector<1x32xf32>
    %cst_47 = arith.constant 1.280000e+02 : f32
    %89 = vector.broadcast %cst_47 : f32 to vector<1x32xf32>
    %90 = arith.divf %88, %89 : vector<1x32xf32>
    %91 = vector.broadcast %90 : vector<1x32xf32> to vector<128x32xf32>
    %92 = arith.subf %86, %91 : vector<128x32xf32>
    %93 = arith.mulf %92, %92 : vector<128x32xf32>
    %cst_48 = arith.constant dense<0.000000e+00> : vector<32xf32>
    %94 = vector.multi_reduction <add>, %93, %cst_48 [0] : vector<128x32xf32> to vector<32xf32>
    %95 = vector.shape_cast %94 : vector<32xf32> to vector<1x32xf32>
    %cst_49 = arith.constant 1.280000e+02 : f32
    %96 = vector.broadcast %cst_49 : f32 to vector<1x32xf32>
    %97 = arith.divf %95, %96 : vector<1x32xf32>
    %cst_50 = arith.constant 9.99999974E-6 : f32
    %98 = vector.broadcast %cst_50 : f32 to vector<1x32xf32>
    %99 = arith.addf %97, %98 : vector<1x32xf32>
    %100 = math.rsqrt %99 : vector<1x32xf32>
    %101 = vector.broadcast %100 : vector<1x32xf32> to vector<128x32xf32>
    %102 = arith.mulf %92, %101 : vector<128x32xf32>
    %cst_51 = arith.constant 0.000000e+00 : f32
    %103 = vector.broadcast %cst_51 : f32 to vector<128x32xf32>
    %104 = arith.maximumf %102, %103 : vector<128x32xf32>
    %105 = arith.truncf %104 : vector<128x32xf32> to vector<128x32xbf16>
    %c0_52 = arith.constant 0 : index
    %c0_53 = arith.constant 0 : index
    %106 = vector.load %arg4[%c0_52, %c0_53] : memref<32x128xbf16, #tpu.memory_space<vmem>>, vector<32x128xbf16>
    %cst_54 = arith.constant dense<0.000000e+00> : vector<128x128xf32>
    %107 = tpu.matmul %105, %106, %cst_54 {dimension_numbers = #tpu.dot_dimension_numbers<[1], [0], [0], [1], [0, 0, 1, 1], [], []>} : vector<128x32xbf16>, vector<32x128xbf16>, vector<128x128xf32> -> vector<128x128xf32>
    %cst_55 = arith.constant dense<0.000000e+00> : vector<128xf32>
    %108 = vector.multi_reduction <add>, %107, %cst_55 [0] : vector<128x128xf32> to vector<128xf32>
    %109 = vector.shape_cast %108 : vector<128xf32> to vector<1x128xf32>
    %cst_56 = arith.constant 1.280000e+02 : f32
    %110 = vector.broadcast %cst_56 : f32 to vector<1x128xf32>
    %111 = arith.divf %109, %110 : vector<1x128xf32>
    %112 = vector.broadcast %111 : vector<1x128xf32> to vector<128x128xf32>
    %113 = arith.subf %107, %112 : vector<128x128xf32>
    %114 = arith.mulf %113, %113 : vector<128x128xf32>
    %cst_57 = arith.constant dense<0.000000e+00> : vector<128xf32>
    %115 = vector.multi_reduction <add>, %114, %cst_57 [0] : vector<128x128xf32> to vector<128xf32>
    %116 = vector.shape_cast %115 : vector<128xf32> to vector<1x128xf32>
    %cst_58 = arith.constant 1.280000e+02 : f32
    %117 = vector.broadcast %cst_58 : f32 to vector<1x128xf32>
    %118 = arith.divf %116, %117 : vector<1x128xf32>
    %cst_59 = arith.constant 9.99999974E-6 : f32
    %119 = vector.broadcast %cst_59 : f32 to vector<1x128xf32>
    %120 = arith.addf %118, %119 : vector<1x128xf32>
    %121 = math.rsqrt %120 : vector<1x128xf32>
    %122 = vector.broadcast %121 : vector<1x128xf32> to vector<128x128xf32>
    %123 = arith.mulf %113, %122 : vector<128x128xf32>
    %c0_60 = arith.constant 0 : index
    %c0_61 = arith.constant 0 : index
    %c0_62 = arith.constant 0 : index
    %c0_63 = arith.constant 0 : index
    %124 = vector.load %arg0[%c0_60, %c0_61, %c0_62, %c0_63] : memref<2x8x8x128xf32, #tpu.memory_space<vmem>>, vector<2x8x8x128xf32>
    %125 = vector.shape_cast %124 : vector<2x8x8x128xf32> to vector<128x128xf32>
    %126 = arith.addf %123, %125 : vector<128x128xf32>
    %cst_64 = arith.constant 0.000000e+00 : f32
    %127 = vector.broadcast %cst_64 : f32 to vector<128x128xf32>
    %128 = arith.maximumf %126, %127 : vector<128x128xf32>
    %129 = vector.shape_cast %128 : vector<128x128xf32> to vector<2x8x8x128xf32>
    %c0_65 = arith.constant 0 : index
    %c0_66 = arith.constant 0 : index
    %c0_67 = arith.constant 0 : index
    %c0_68 = arith.constant 0 : index
    %130 = vector.load %arg5[%c0_65, %c0_66, %c0_67, %c0_68] : memref<2x8x8x128xf32, #tpu.memory_space<vmem>>, vector<2x8x8x128xf32>
    tpu.vector_store %arg5[%c0_65, %c0_66, %c0_67, %c0_68], %129 {strides = array<i32>} : memref<2x8x8x128xf32, #tpu.memory_space<vmem>>, vector<2x8x8x128xf32>,
    return
  }
}

</mosaic_0001>

<bundles_post_ra>
// kernel: tpu_custom_call.1
= control target key start
LH: loop header
LB: loop body
LE: loop exit
PB: predicated region body
PF: predicated region fallthrough
CT: control target
= control target key end

     0   :  { %10 = vsyncpa [#allocation3], 0  ;;  %s4891_s0 = inlined_call_operand.hbm [shape: f32[2,8,8,128], index: 0, kind: input, shape index: {}]   ;;  %s4892_s1 = inlined_call_operand.hbm [shape: f32[2,8,8,32], index: 1, kind: input, shape index: {}]   ;;  %s4893_s2 = inlined_call_operand.vmem [shape: bf16[128,32], index: 2, kind: input, shape index: {}]   ;;  %s4894_s3 = inlined_call_operand.hbm [shape: bf16[9,32,32], index: 3, kind: input, shape index: {}]   ;;  %s4895_s4 = inlined_call_operand.vmem [shape: bf16[32,128], index: 4, kind: input, shape index: {}]   ;;  %s4896_s5 = inlined_call_operand.hbm [shape: f32[2,8,8,128], index: 5, kind: output, shape index: {}]  }
   0x1   :  { %11 = vsyncpa [#allocation6], 0 }
   0x2   :  { %12 = vsyncpa [#allocation4], 0  ;;  %s3737_s18 = smov [#allocation5]   ;;  %s3738_s20 = smov [#allocation2]  }
   0x3   :  { %s30_s19 = sshll.u32 %s3737_s18, 4  ;;  %s18_s21 = sshll.u32 %s3738_s20, 4  ;;  %s31_s19 = int_to_ptr.vmem [resolvable:$true] %s30_s19  ;;  %s3776_s21 = int_to_ptr.vmem [resolvable:$true] %s18_s21 }
   0x4   :  { %s3643_s24 = scalar_lea.hbm %s4892_s1, 2048 }
   0x5   :  { %p3644_p0 = scmp.ne.s32.totalorder %s4892_s1, %s3643_s24  ;;  %p3647_p1 = scmp.lt.u32.totalorder %s3643_s24, %s4892_s1 }
   0x7   :  { %p3649_p2 = pnand %p3647_p1, %p3644_p0 }
   0x9   :  { %3652 = shalt.err (!%p3649_p2)
}
   0xa   :  { %s3653_s29 = scalar_lea.vmem %s31_s19, 2048  ;;  %p3658_p4 = scmp.lt.s32.totalorder %s31_s19, %s31_s19 }
   0xb   :  { %p3654_p3 = scmp.ne.s32.totalorder %s31_s19, %s3653_s29  ;;  %p3659_p5 = scmp.lt.s32.totalorder %s3653_s29, %s3653_s29 }
   0xd   :  { %p3660_p6 = por %p3659_p5, %p3658_p4 }
   0xf   :  { %p3661_p7 = pnand %p3660_p6, %p3654_p3 }
  0x11   :  { %3664 = shalt.err (!%p3661_p7)
}
  0x12   :  { %s3739_s30 = smov 128   ;;  %s3740_s6 = smov 8  }
  0x13   :  { %36 = dma.hbm_to_vmem [thread:$0]  %s4892_s1, 2048, %s31_s19, [#allocation6], %s3739_s30, %s3739_s30, %s3740_s6  }
  0x14   :  { %s3665_s11 = scalar_lea.hbm %s4891_s0, 2048 }
  0x15   :  { %p3666_p8 = scmp.ne.s32.totalorder %s4891_s0, %s3665_s11  ;;  %p3669_p9 = scmp.lt.u32.totalorder %s3665_s11, %s4891_s0 }
  0x17   :  { %p3671_p10 = pnand %p3669_p9, %p3666_p8 }
  0x19   :  { %3674 = shalt.err (!%p3671_p10)
}
  0x1a   :  { %s3675_s16 = scalar_lea.vmem %s3776_s21, 2048  ;;  %p3680_p12 = scmp.lt.s32.totalorder %s3776_s21, %s3776_s21 }
  0x1b   :  { %p3676_p11 = scmp.ne.s32.totalorder %s3776_s21, %s3675_s16  ;;  %p3681_p13 = scmp.lt.s32.totalorder %s3675_s16, %s3675_s16 }
  0x1d   :  { %p3682_p0 = por %p3681_p13, %p3680_p12 }
  0x1f   :  { %p3683_p1 = pnand %p3682_p0, %p3676_p11 }
  0x21   :  { %3686 = shalt.err (!%p3683_p1)
}
  0x22   :  { %24 = dma.hbm_to_vmem [thread:$0]  %s4891_s0, 2048, %s3776_s21, [#allocation3], %s3739_s30, %s3739_s30, %s3740_s6  }
  0x23   :  { %s3741_s18 = smov [#allocation7]   ;;  %s3687_s23 = scalar_lea.hbm %s4894_s3, 2304 }
  0x24   :  { %s44_s19 = sshll.u32 %s3741_s18, 4  ;;  %p3688_p2 = scmp.ne.s32.totalorder %s4894_s3, %s3687_s23  ;;  %s45_s19 = int_to_ptr.vmem [resolvable:$true] %s44_s19 }
  0x25   :  { %p3691_p3 = scmp.lt.u32.totalorder %s3687_s23, %s4894_s3 }
  0x27   :  { %p3693_p4 = pnand %p3691_p3, %p3688_p2 }
  0x29   :  { %3696 = shalt.err (!%p3693_p4)
}
  0x2a   :  { %s3697_s28 = scalar_lea.vmem %s45_s19, 2304  ;;  %p3702_p6 = scmp.lt.s32.totalorder %s45_s19, %s45_s19 }
  0x2b   :  { %p3698_p5 = scmp.ne.s32.totalorder %s45_s19, %s3697_s28  ;;  %p3703_p7 = scmp.lt.s32.totalorder %s3697_s28, %s3697_s28 }
  0x2d   :  { %p3704_p8 = por %p3703_p7, %p3702_p6 }
  0x2f   :  { %p3705_p9 = pnand %p3704_p8, %p3698_p5 }
  0x31   :  { %3708 = shalt.err (!%p3705_p9)
}
  0x32   :  { %s3742_s0 = smov 64   ;;  %s3743_s21 = smov 4  }
  0x33   :  { %50 = dma.hbm_to_vmem [thread:$0]  %s4894_s3, 2304, %s45_s19, [#allocation6], %s3742_s0, %s3742_s0, %s3743_s21  }
  0x34   :  { %3731 = dma.done.wait [#allocation3], 2048  }
  0x35   :  { %3732 = vsyncadd [#allocation3], 4294965248 }
  0x36   :  { %3733 = dma.done.wait [#allocation6], 4352  }
  0x37   :  { %3734 = vsyncadd [#allocation6], 4294962944  ;;  %v3593_v0 = vld [vmem:[%s4893_s2] sm:$0xff]   ;;  %v3594_v1 = vld [vmem:[%s4893_s2 + $0x8] sm:$0xff]   ;;  %vm264_vm0 = vcmask 261120   ;;  %vm592_vm1 = vcmask 1040384  }
  0x38   :  { %3224 = vmatprep.subr.bf16.mxu0 %v3593_v0  ;;  %v3595_v2 = vld [vmem:[%s4893_s2 + $0x10] sm:$0xff]   ;;  %v3596_v3 = vld [vmem:[%s4893_s2 + $0x18] sm:$0xff]   ;;  %v63_v4 = vld [vmem:[#allocation2] sm:$0xff]  ;;  %vm593_vm2 = vsmask.f32 256  ;;  %vm612_vm4 = vcmask 1044480  }
  0x39   :  { %3225 = vmatpush3.bf16.msra.mxu0 %v3593_v0  ;;  %v64_v5 = vld [vmem:[#allocation2 + $0x8] sm:$0xff]  ;;  %v3597_v7 = vld [vmem:[%s4893_s2 + $0x20] sm:$0xff]   ;;  %v3599_v9 = vld [vmem:[%s4893_s2 + $0x30] sm:$0xff]   ;;  %vm613_vm5 = vsmask.f32 4352  ;;  %vm1226_vm7 = vcmask 1042432  }
  0x3a   :  { %3226 = vmatprep.subr.bf16.mxu0 %v3594_v1  ;;  %v79_v6 = vpack.c.bf16 %v64_v5, %v63_v4  ;;  %v3598_v8 = vld [vmem:[%s4893_s2 + $0x28] sm:$0xff]   ;;  %v3600_v10 = vld [vmem:[%s4893_s2 + $0x38] sm:$0xff]   ;;  %v65_v11 = vld [vmem:[#allocation2 + $0x10] sm:$0xff]  ;;  %vm1227_vm8 = vcmask 1046532   ;;  %vm711_vm10 = vsmask.f32 3328 }
  0x3b   :  { %v66_v12 = vld [vmem:[#allocation2 + $0x18] sm:$0xff]  ;;  %v67_v13 = vld [vmem:[#allocation2 + $0x20] sm:$0xff]  ;;  %v68_v14 = vld [vmem:[#allocation2 + $0x28] sm:$0xff]  ;;  %vm712_vm11 = vsmask.f32 7440 }
  0x3c   :  { %3240 = vmatprep.mubr.bf16.mxu0 %v79_v6  ;;  %v80_v15 = vpack.c.bf16 %v66_v12, %v65_v11  ;;  %v81_v16 = vpack.c.bf16 %v68_v14, %v67_v13  ;;  %v69_v17 = vld [vmem:[#allocation2 + $0x30] sm:$0xff]  ;;  %v70_v18 = vld [vmem:[#allocation2 + $0x38] sm:$0xff]  ;;  %v71_v19 = vld [vmem:[#allocation2 + $0x40] sm:$0xff] }
  0x3d   :  { %3227 = vmatpush3.bf16.msra.mxu0 %v3594_v1  ;;  %v72_v20 = vld [vmem:[#allocation2 + $0x48] sm:$0xff]  ;;  %v82_v21 = vpack.c.bf16 %v70_v18, %v69_v17  ;;  %v73_v23 = vld [vmem:[#allocation2 + $0x50] sm:$0xff]  ;;  %v74_v24 = vld [vmem:[#allocation2 + $0x58] sm:$0xff] }
  0x3e   :  { %3228 = vmatprep.subr.bf16.mxu0 %v3595_v2  ;;  %v83_v22 = vpack.c.bf16 %v72_v20, %v71_v19  ;;  %v75_v25 = vld [vmem:[#allocation2 + $0x60] sm:$0xff]  ;;  %v76_v26 = vld [vmem:[#allocation2 + $0x68] sm:$0xff]  ;;  %v84_v27 = vpack.c.bf16 %v74_v24, %v73_v23  ;;  %v77_v29 = vld [vmem:[#allocation2 + $0x70] sm:$0xff] }
  0x3f   :  { %v85_v28 = vpack.c.bf16 %v76_v26, %v75_v25  ;;  %v78_v30 = vld [vmem:[#allocation2 + $0x78] sm:$0xff]  ;;  %v103_v32 = vld [vmem:[#allocation5] sm:$0xff]  ;;  %v3601_v34 = vld [vmem:[#allocation7 + $0x30] sm:$0xff]  }
  0x40   :  { %v86_v31 = vpack.c.bf16 %v78_v30, %v77_v29  ;;  %v105_v35 = vld [vmem:[#allocation5 + $0x10] sm:$0xff]  ;;  %v104_v37 = vld [vmem:[#allocation5 + $0x8] sm:$0xff]  ;;  %v3602_v38 = vld [vmem:[#allocation7 + $0x38] sm:$0xff]   ;;  %3316 = vmatprep.subr.bf16.mxu1 %v3601_v34 }
  0x41   :  { %3229 = vmatpush3.bf16.msra.mxu0 %v3595_v2  ;;  %v106_v41 = vld [vmem:[#allocation5 + $0x18] sm:$0xff]  ;;  %3317 = vmatpush3.bf16.msra.mxu1 %v3601_v34  ;;  %v107_v49 = vld [vmem:[#allocation5 + $0x20] sm:$0xff]  ;;  %v109_v53 = vld [vmem:[#allocation5 + $0x30] sm:$0xff] }
  0x42   :  { %3230 = vmatprep.subr.bf16.mxu0 %v3596_v3  ;;  %3318 = vmatprep.subr.bf16.mxu1 %v3602_v38  ;;  %v108_v55 = vld [vmem:[#allocation5 + $0x28] sm:$0xff]  ;;  %v110_v60 = vld [vmem:[#allocation5 + $0x38] sm:$0xff]  ;;  %v111_v5 = vld [vmem:[#allocation5 + $0x40] sm:$0xff] }
  0x43   :  { %v3877_v6 = vld [vmem:[#allocation7 + $0x40] sm:$0xff]   ;;  %v112_v12 = vld [vmem:[#allocation5 + $0x48] sm:$0xff]  ;;  %v114_v17 = vld [vmem:[#allocation5 + $0x58] sm:$0xff] }
  0x44   :  { %v3605_v23 = vld [vmem:[#allocation7 + $0x18] sm:$0xff]   ;;  %v116_v34 = vld [vmem:[#allocation5 + $0x68] sm:$0xff]  ;;  %vm3954_vm3 = vmand %vm592_vm1, %vm593_vm2 }
  0x45   :  { %3231 = vmatpush3.bf16.msra.mxu0 %v3596_v3  ;;  %3319 = vmatpush3.bf16.msra.mxu1 %v3602_v38  ;;  %vm3964_vm6 = vmand %vm612_vm4, %vm613_vm5 }
  0x46   :  { %3232 = vmatprep.subr.bf16.mxu0 %v3597_v7  ;;  %3336 = vmatprep.subr.bf16.mxu1 %v3877_v6  ;;  %vm3996_vm9 = vmor %vm1226_vm7, %vm1227_vm8 }
  0x47   :  { %vm4031_vm12 = vmor %vm711_vm10, %vm712_vm11 }
  0x49   :  { %3233 = vmatpush3.bf16.msra.mxu0 %v3597_v7 }
  0x4a   :  { %3234 = vmatprep.subr.bf16.mxu0 %v3598_v8 }
  0x4d   :  { %3235 = vmatpush3.bf16.msra.mxu0 %v3598_v8 }
  0x4e   :  { %3236 = vmatprep.subr.bf16.mxu0 %v3599_v9 }
  0x51   :  { %3237 = vmatpush3.bf16.msra.mxu0 %v3599_v9 }
  0x52   :  { %3238 = vmatprep.subr.bf16.mxu0 %v3600_v10 }
  0x55   :  { %3239 = vmatpush3.bf16.msra.mxu0 %v3600_v10  ;;  %v113_v10 = vld [vmem:[#allocation5 + $0x50] sm:$0xff] }
  0x58   :  { %3241 = vmatmul.mubr.bf16.vlgmr.msra.gmra.mrb[0].mxu0 %v80_v15 }
  0x59   :  { %3244 = vmatprep.mubr.bf16.mxu0 %v81_v16 }
  0x60   :  { %3245 = vmatmul.mubr.bf16.gmra.mrb[4].mxu0 %v82_v21 }
  0x61   :  { %3248 = vmatprep.mubr.bf16.mxu0 %v83_v22  ;;  %v3604_v22 = vld [vmem:[#allocation7 + $0x10] sm:$0xff]  }
  0x62   :  { %3256 = vmatprep.subr.bf16.mxu0 %v3604_v22 }
  0x63   :  { %3257 = vmatpush3.bf16.msra.mxu0 %v3604_v22 }
  0x64   :  { %3258 = vmatprep.subr.bf16.mxu0 %v3605_v23 }
  0x67   :  { %3259 = vmatpush3.bf16.msra.mxu0 %v3605_v23 }
  0x68   :  { %3249 = vmatmul.mubr.bf16.gmra.mrb[8].mxu0 %v84_v27 }
  0x69   :  { %3252 = vmatprep.mubr.bf16.mxu0 %v85_v28  ;;  %v115_v28 = vld [vmem:[#allocation5 + $0x60] sm:$0xff] }
  0x70   :  { %3253 = vmatmul.mubr.bf16.gmra.mrb[12].mxu0 %v86_v31 }
 0x12b   :  { %v3242_v33 = vpop.f32.mrb[0].mxu0 }
 0x12c   :  { %v201_v36 = vpop.f32.mrb[1].mxu0  ;;  %v3851_v43 = vadd.f32 %v3242_v33, %v105_v35 }
 0x12d   :  { %v3849_v39 = vadd.f32 %v201_v36, %v103_v32  ;;  %v3243_v40 = vpop.f32.mrb[2].mxu0  ;;  %v117_v32 = vld [vmem:[#allocation5 + $0x70] sm:$0xff] }
 0x12e   :  { %v204_v42 = vpop.f32.mrb[3].mxu0  ;;  %v3857_v46 = vadd.f32 %v3243_v40, %v106_v41  ;;  %v268_v50 = vsel %vm264_vm0, %v3851_v43, 0.0  ;;  %v118_v40 = vld [vmem:[#allocation5 + $0x78] sm:$0xff] }
 0x12f   :  { %v3853_v44 = vadd.f32 %v204_v42, %v104_v37  ;;  %v265_v45 = vsel %vm264_vm0, %v3849_v39, 0.0 }
 0x130   :  { %v270_v56 = vsel %vm264_vm0, %v3857_v46, 0.0 }
 0x131   :  { %v266_v47 = vsel %vm264_vm0, %v3853_v44, 0.0 }
 0x132   :  { %v267_v48 = vadd.f32 %v266_v47, %v265_v45 }
 0x133   :  { %v3246_v51 = vpop.f32.mrb[4].mxu0 }
 0x134   :  { %v269_v52 = vadd.f32 %v268_v50, %v267_v48  ;;  %v217_v54 = vpop.f32.mrb[5].mxu0  ;;  %v3867_v62 = vadd.f32 %v3246_v51, %v109_v53 }
 0x135   :  { %v3865_v57 = vadd.f32 %v217_v54, %v107_v49  ;;  %v3247_v58 = vpop.f32.mrb[6].mxu0 }
 0x136   :  { %v271_v59 = vadd.f32 %v270_v56, %v269_v52  ;;  %v220_v61 = vpop.f32.mrb[7].mxu0  ;;  %v3873_v2 = vadd.f32 %v3247_v58, %v110_v60  ;;  %v276_v7 = vsel %vm264_vm0, %v3867_v62, 0.0 }
 0x137   :  { %v272_v63 = vsel %vm264_vm0, %v3865_v57, 0.0  ;;  %v3871_v0 = vadd.f32 %v220_v61, %v108_v55 }
 0x138   :  { %v273_v1 = vadd.f32 %v272_v63, %v271_v59  ;;  %v278_v13 = vsel %vm264_vm0, %v3873_v2, 0.0 }
 0x139   :  { %v274_v3 = vsel %vm264_vm0, %v3871_v0, 0.0 }
 0x13a   :  { %v275_v4 = vadd.f32 %v274_v3, %v273_v1 }
 0x13b   :  { %v3250_v8 = vpop.f32.mrb[8].mxu0 }
 0x13c   :  { %v277_v9 = vadd.f32 %v276_v7, %v275_v4  ;;  %v233_v11 = vpop.f32.mrb[9].mxu0  ;;  %v242_v19 = vadd.f32 %v3250_v8, %v113_v10 }
 0x13d   :  { %v234_v14 = vadd.f32 %v233_v11, %v111_v5  ;;  %v3251_v15 = vpop.f32.mrb[10].mxu0 }
 0x13e   :  { %v279_v16 = vadd.f32 %v278_v13, %v277_v9  ;;  %v236_v18 = vpop.f32.mrb[11].mxu0  ;;  %v245_v25 = vadd.f32 %v3251_v15, %v114_v17  ;;  %v284_v29 = vsel %vm264_vm0, %v242_v19, 0.0 }
 0x13f   :  { %v280_v20 = vsel %vm264_vm0, %v234_v14, 0.0  ;;  %v237_v21 = vadd.f32 %v236_v18, %v112_v12 }
 0x140   :  { %v281_v24 = vadd.f32 %v280_v20, %v279_v16  ;;  %v286_v35 = vsel %vm264_vm0, %v245_v25, 0.0 }
 0x141   :  { %v282_v26 = vsel %vm264_vm0, %v237_v21, 0.0 }
 0x142   :  { %v283_v27 = vadd.f32 %v282_v26, %v281_v24 }
 0x143   :  { %v3254_v30 = vpop.f32.mrb[12].mxu0 }
 0x144   :  { %v285_v31 = vadd.f32 %v284_v29, %v283_v27  ;;  %v249_v33 = vpop.f32.mrb[13].mxu0  ;;  %v258_v42 = vadd.f32 %v3254_v30, %v117_v32  ;;  %v3744_v30 = vmov 0  }
 0x145   :  { %v250_v36 = vadd.f32 %v249_v33, %v115_v28  ;;  %v3255_v37 = vpop.f32.mrb[14].mxu0 }
 0x146   :  { %v287_v38 = vadd.f32 %v286_v35, %v285_v31  ;;  %v252_v41 = vpop.f32.mrb[15].mxu0  ;;  %v261_v49 = vadd.f32 %v3255_v37, %v118_v40  ;;  %v292_v52 = vsel %vm264_vm0, %v258_v42, 0.0  ;;  %v459_v31 = vrot.slane %v3744_v30, 7 }
 0x147   :  { %v288_v45 = vsel %vm264_vm0, %v250_v36, 0.0  ;;  %v253_v47 = vadd.f32 %v252_v41, %v116_v34 }
 0x148   :  { %v289_v48 = vadd.f32 %v288_v45, %v287_v38  ;;  %v294_v54 = vsel %vm264_vm0, %v261_v49, 0.0  ;;  %v595_v41 = vsel %vm3954_vm3, 0, %v459_v31 }
 0x149   :  { %v290_v50 = vsel %vm264_vm0, %v253_v47, 0.0 }
 0x14a   :  { %v291_v51 = vadd.f32 %v290_v50, %v289_v48 }
 0x14c   :  { %v293_v53 = vadd.f32 %v292_v52, %v291_v51  ;;  %v3980_v52 = vld [vmem:[#allocation7] sm:$0xff]  }
 0x14d   :  { %3276 = vmatprep.subr.bf16.mxu0 %v3980_v52 }
 0x14e   :  { %v295_v55 = vadd.f32 %v294_v54, %v293_v53 }
 0x150   :  { %v296_v56 = vrot.slane %v295_v55, 4 }
 0x152   :  { %v297_v58 = vadd.f32 %v296_v56, %v295_v55 }
 0x154   :  { %v298_v59 = vrot.slane %v297_v58, 2 }
 0x156   :  { %v299_v60 = vadd.f32 %v298_v59, %v297_v58 }
 0x158   :  { %v300_v61 = vrot.slane %v299_v60, 1 }
 0x15a   :  { %v301_v63 = vadd.f32 %v300_v61, %v299_v60 }
 0x15c   :  { %v303_v1 = vmul.f32 0.0078125, %v301_v63 }
 0x15e   :  { %v3893_v3 = vsub.f32 %v3849_v39, %v303_v1  ;;  %v3896_v4 = vsub.f32 %v3853_v44, %v303_v1  ;;  %v3899_v5 = vsub.f32 %v3851_v43, %v303_v1  ;;  %v3902_v7 = vsub.f32 %v3857_v46, %v303_v1 }
 0x15f   :  { %v3905_v8 = vsub.f32 %v3865_v57, %v303_v1  ;;  %v3908_v9 = vsub.f32 %v3871_v0, %v303_v1  ;;  %v3911_v10 = vsub.f32 %v3867_v62, %v303_v1  ;;  %v3914_v39 = vsub.f32 %v3873_v2, %v303_v1 }
 0x160   :  { %v3916_v44 = vsub.f32 %v234_v14, %v303_v1  ;;  %v3918_v11 = vsub.f32 %v237_v21, %v303_v1  ;;  %v3920_v43 = vsub.f32 %v242_v19, %v303_v1  ;;  %v3922_v46 = vsub.f32 %v245_v25, %v303_v1 }
 0x161   :  { %v3924_v12 = vsub.f32 %v250_v36, %v303_v1  ;;  %v3926_v57 = vsub.f32 %v253_v47, %v303_v1  ;;  %v3928_v0 = vsub.f32 %v258_v42, %v303_v1  ;;  %v3930_v13 = vsub.f32 %v261_v49, %v303_v1 }
 0x162   :  { %v320_v62 = vmul.f32 %v3893_v3, %v3893_v3  ;;  %v321_v2 = vmul.f32 %v3896_v4, %v3896_v4  ;;  %v322_v14 = vmul.f32 %v3899_v5, %v3899_v5  ;;  %v323_v15 = vmul.f32 %v3902_v7, %v3902_v7 }
 0x163   :  { %v324_v19 = vmul.f32 %v3905_v8, %v3905_v8  ;;  %v325_v22 = vmul.f32 %v3908_v9, %v3908_v9  ;;  %v326_v25 = vmul.f32 %v3911_v10, %v3911_v10  ;;  %v327_v28 = vmul.f32 %v3914_v39, %v3914_v39 }
 0x164   :  { %v336_v16 = vsel %vm264_vm0, %v320_v62, 0.0  ;;  %v337_v17 = vsel %vm264_vm0, %v321_v2, 0.0  ;;  %v339_v20 = vsel %vm264_vm0, %v322_v14, 0.0  ;;  %v341_v23 = vsel %vm264_vm0, %v323_v15, 0.0 }
 0x165   :  { %v338_v18 = vadd.f32 %v337_v17, %v336_v16  ;;  %v343_v26 = vsel %vm264_vm0, %v324_v19, 0.0  ;;  %v345_v29 = vsel %vm264_vm0, %v325_v22, 0.0  ;;  %v328_v34 = vmul.f32 %v3916_v44, %v3916_v44 }
 0x166   :  { %v347_v35 = vsel %vm264_vm0, %v326_v25, 0.0  ;;  %v329_v37 = vmul.f32 %v3918_v11, %v3918_v11  ;;  %v349_v38 = vsel %vm264_vm0, %v327_v28, 0.0  ;;  %v330_v45 = vmul.f32 %v3920_v43, %v3920_v43 }
 0x167   :  { %v340_v21 = vadd.f32 %v339_v20, %v338_v18  ;;  %v351_v47 = vsel %vm264_vm0, %v328_v34, 0.0  ;;  %v3975_v49 = vsel %vm3964_vm6, %v595_v41, 0  ;;  %v331_v50 = vmul.f32 %v3922_v46, %v3922_v46 }
 0x168   :  { %v353_v51 = vsel %vm264_vm0, %v329_v37, 0.0  ;;  %v332_v54 = vmul.f32 %v3924_v12, %v3924_v12  ;;  %v355_v55 = vsel %vm264_vm0, %v330_v45, 0.0  ;;  %v2887_v56 = vcombine.low %v3975_v49, %v3975_v49 }
 0x169   :  { %v342_v24 = vadd.f32 %v341_v23, %v340_v21  ;;  %v2888_v59 = vcombine.high %v3975_v49, %v3975_v49  ;;  %v333_v60 = vmul.f32 %v3926_v57, %v3926_v57  ;;  %v357_v61 = vsel %vm264_vm0, %v331_v50, 0.0 }
 0x16a   :  { %v334_v1 = vmul.f32 %v3928_v0, %v3928_v0  ;;  %v359_v62 = vsel %vm264_vm0, %v332_v54, 0.0  ;;  %v2953_v15 = vrot.slane %v2887_v56, 9  ;;  %v335_v17 = vmul.f32 %v3930_v13, %v3930_v13 }
 0x16b   :  { %v344_v27 = vadd.f32 %v343_v26, %v342_v24  ;;  %v1231_v16 = vrot.slane %v2888_v59, 5  ;;  %v361_v18 = vsel %vm264_vm0, %v333_v60, 0.0  ;;  %v715_v34 = vshrl.u32 %v2887_v56, 16 }
 0x16c   :  { %v363_v21 = vsel %vm264_vm0, %v334_v1, 0.0  ;;  %v365_v23 = vsel %vm264_vm0, %v335_v17, 0.0  ;;  %v724_v41 = vshll.u32 %v2888_v59, 16 }
 0x16d   :  { %v346_v32 = vadd.f32 %v345_v29, %v344_v27  ;;  %v4005_v20 = vsel %vm3996_vm9, %v2953_v15, %v1231_v16 }
 0x16f   :  { %v348_v36 = vadd.f32 %v347_v35, %v346_v32  ;;  %v718_v35 = vshll.u32 %v2887_v56, 16 }
 0x171   :  { %v350_v42 = vadd.f32 %v349_v38, %v348_v36  ;;  %v717_v36 = vrot.slane %v715_v34, 4  ;;  %v720_v37 = vrot.slane %v718_v35, 5 }
 0x173   :  { %v352_v48 = vadd.f32 %v351_v47, %v350_v42  ;;  %v721_v38 = vor.u32 %v720_v37, %v717_v36  ;;  %v726_v47 = vrot.slane %v724_v41, 5 }
 0x175   :  { %v354_v53 = vadd.f32 %v353_v51, %v352_v48  ;;  %v722_v45 = vrot.slane %v721_v38, 4 }
 0x177   :  { %v356_v58 = vadd.f32 %v355_v55, %v354_v53 }
 0x179   :  { %v358_v63 = vadd.f32 %v357_v61, %v356_v58 }
 0x17b   :  { %v360_v14 = vadd.f32 %v359_v62, %v358_v63 }
 0x17d   :  { %v362_v19 = vadd.f32 %v361_v18, %v360_v14 }
 0x17f   :  { %v364_v22 = vadd.f32 %v363_v21, %v362_v19 }
 0x181   :  { %v366_v24 = vadd.f32 %v365_v23, %v364_v22 }
 0x183   :  { %v367_v25 = vrot.slane %v366_v24, 4 }
 0x185   :  { %v368_v26 = vadd.f32 %v367_v25, %v366_v24 }
 0x187   :  { %v369_v27 = vrot.slane %v368_v26, 2 }
 0x189   :  { %v370_v28 = vadd.f32 %v369_v27, %v368_v26 }
 0x18b   :  { %v371_v29 = vrot.slane %v370_v28, 1 }
 0x18d   :  { %v372_v30 = vadd.f32 %v371_v29, %v370_v28 }
 0x18f   :  { %v373_v31 = vmul.f32 0.0078125, %v372_v30 }
 0x191   :  { %v374_v32 = vadd.f32 1e-05, %v373_v31 }
 0x193   :  { %3621 = vrsqrt.f32 %v374_v32 }
 0x19d   :  { %v4009_v42 = vpop.eup %3621 }
 0x19e   :  { %v4013_v48 = vmul.f32 %v4009_v42, %v3922_v46  ;;  %v388_v50 = vmul.f32 %v4009_v42, %v3924_v12  ;;  %v389_v51 = vmul.f32 %v4009_v42, %v3926_v57  ;;  %v390_v53 = vmul.f32 %v4009_v42, %v3928_v0 }
 0x19f   :  { %v4023_v54 = vmul.f32 %v4009_v42, %v3930_v13  ;;  %v376_v55 = vmul.f32 %v4009_v42, %v3893_v3  ;;  %v377_v46 = vmul.f32 %v4009_v42, %v3896_v4  ;;  %v378_v56 = vmul.f32 %v4009_v42, %v3899_v5 }
 0x1a0   :  { %v404_v57 = vmax.f32 %v388_v50, 0.0  ;;  %v405_v58 = vmax.f32 %v389_v51, 0.0  ;;  %v379_v0 = vmul.f32 %v4009_v42, %v3902_v7  ;;  %v380_v3 = vmul.f32 %v4009_v42, %v3905_v8 }
 0x1a1   :  { %v392_v13 = vmax.f32 %v376_v55, 0.0  ;;  %v393_v59 = vmax.f32 %v377_v46, 0.0  ;;  %v394_v60 = vmax.f32 %v378_v56, 0.0  ;;  %v406_v61 = vmax.f32 %v390_v53, 0.0 }
 0x1a2   :  { %v3105_v4 = vpack.c.bf16 %v405_v58, %v405_v58  ;;  %v395_v63 = vmax.f32 %v379_v0, 0.0  ;;  %v4041_v5 = vsel %vm4031_vm12, %v722_v45, %v726_v47  ;;  %v381_v15 = vmul.f32 %v4009_v42, %v3908_v9 }
 0x1a3   :  { %4927 = vst [vmem:[#allocation12_spill] sm:$0xff] %v4041_v5  ;;  %v3092_v1 = vpack.c.bf16 %v392_v13, %v392_v13  ;;  %v3093_v62 = vpack.c.bf16 %v393_v59, %v393_v59  ;;  %v3094_v14 = vpack.c.bf16 %v394_v60, %v394_v60  ;;  %v4045_v7 = vpack.c.bf16 %v404_v57, %v404_v57 }
 0x1a4   :  { %v555_v16 = vshrl.u32 %v3105_v4, 16  ;;  %v3095_v17 = vpack.c.bf16 %v395_v63, %v395_v63  ;;  %v396_v18 = vmax.f32 %v380_v3, 0.0  ;;  %v558_v19 = vshll.u32 %v3105_v4, 16 }
 0x1a5   :  { %v464_v8 = vshrl.u32 %v3092_v1, 16  ;;  %v467_v21 = vshll.u32 %v3092_v1, 16  ;;  %v471_v22 = vshrl.u32 %v3093_v62, 16  ;;  %v474_v24 = vshll.u32 %v3093_v62, 16 }
 0x1a6   :  { %v557_v23 = vrot.slane %v555_v16, 7  ;;  %v478_v25 = vshrl.u32 %v3094_v14, 16  ;;  %v485_v26 = vshrl.u32 %v3095_v17, 16  ;;  %v481_v29 = vshll.u32 %v3094_v14, 16 }
 0x1a7   :  { %v466_v27 = vrot.slane %v464_v8, 7  ;;  %v473_v28 = vrot.slane %v471_v22, 7  ;;  %v397_v30 = vmax.f32 %v381_v15, 0.0  ;;  %v3096_v34 = vpack.c.bf16 %v396_v18, %v396_v18 }
 0x1a8   :  { %v4047_v31 = vor.u32 %v558_v19, %v557_v23  ;;  %v480_v9 = vrot.slane %v478_v25, 7  ;;  %v487_v32 = vrot.slane %v485_v26, 7  ;;  %v488_v37 = vshll.u32 %v3095_v17, 16 }
 0x1a9   :  { %v469_v35 = vor.u32 %v467_v21, %v466_v27  ;;  %v476_v36 = vor.u32 %v474_v24, %v473_v28  ;;  %v3097_v38 = vpack.c.bf16 %v397_v30, %v397_v30  ;;  %v4049_v41 = vpack.c.bf16 %v406_v61, %v406_v61 }
 0x1aa   :  { %v609_v45 = vsel %vm3954_vm3, 0, %v4047_v31  ;;  %v483_v47 = vor.u32 %v481_v29, %v480_v9  ;;  %v382_v50 = vmul.f32 %v4009_v42, %v3911_v10  ;;  %v490_v55 = vor.u32 %v488_v37, %v487_v32 }
 0x1ab   :  { %v596_v51 = vsel %vm3954_vm3, 0, %v469_v35  ;;  %v597_v53 = vsel %vm3954_vm3, 0, %v476_v36  ;;  %v492_v46 = vshrl.u32 %v3096_v34, 16  ;;  %v499_v0 = vshrl.u32 %v3097_v38, 16 }
 0x1ac   :  { %v598_v56 = vsel %vm3954_vm3, 0, %v483_v47  ;;  %v4064_v57 = vsel %vm3964_vm6, %v596_v51, 0  ;;  %v617_v58 = vsel %vm3964_vm6, %v597_v53, 0  ;;  %v599_v22 = vsel %vm3954_vm3, 0, %v490_v55  ;;  %v3606_v55 = vld [vmem:[#allocation7 + $0x48] sm:$0xff]  }
 0x1ad   :  { %v618_v10 = vsel %vm3964_vm6, %v598_v56, 0  ;;  %v4072_v13 = vcombine.low %v4064_v57, %v4064_v57  ;;  %v4076_v59 = vcombine.high %v4064_v57, %v4064_v57  ;;  %v4078_v60 = vcombine.low %v617_v58, %v617_v58 }
 0x1ae   :  { %v4080_v3 = vcombine.high %v617_v58, %v617_v58  ;;  %v4082_v61 = vcombine.low %v618_v10, %v618_v10  ;;  %v4084_v4 = vcombine.high %v618_v10, %v618_v10  ;;  %v4086_v63 = vcombine.low %v617_v58, %v618_v10 }
 0x1af   :  { %v729_v1 = vshrl.u32 %v4072_v13, 16  ;;  %v732_v62 = vshll.u32 %v4072_v13, 16  ;;  %v738_v14 = vshll.u32 %v4076_v59, 16  ;;  %v743_v15 = vshrl.u32 %v4078_v60, 16 }
 0x1b0   :  { %4928 = vst [vmem:[#allocation13_spill] sm:$0xff] %v4082_v61  ;;  %4929 = vst [vmem:[#allocation14_spill] sm:$0xff] %v4084_v4  ;;  %v746_v16 = vshll.u32 %v4078_v60, 16  ;;  %v752_v17 = vshll.u32 %v4080_v3, 16  ;;  %v757_v18 = vshrl.u32 %v4082_v61, 16  ;;  %v760_v19 = vshll.u32 %v4082_v61, 16 }
 0x1b1   :  { %v731_v8 = vrot.slane %v729_v1, 4  ;;  %v745_v21 = vrot.slane %v743_v15, 4  ;;  %v495_v23 = vshll.u32 %v3096_v34, 16  ;;  %v734_v24 = vrot.slane %v732_v62, 5 }
 0x1b2   :  { %v4098_v25 = vrot.slane %v738_v14, 5  ;;  %v748_v26 = vrot.slane %v746_v16, 5  ;;  %v754_v27 = vrot.slane %v752_v17, 5  ;;  %v759_v28 = vrot.slane %v757_v18, 4 }
 0x1b3   :  { %v762_v29 = vrot.slane %v760_v19, 5  ;;  %v766_v30 = vshll.u32 %v4084_v4, 16  ;;  %v2986_v9 = vcombine.low %v4064_v57, %v617_v58  ;;  %v4104_v35 = vsel %vm3964_vm6, %v599_v22, 0  ;;  %v4129_v19 = vld [vmem:[#allocation7 + $0x50] sm:$0xff]  }
 0x1b4   :  { %v749_v32 = vor.u32 %v748_v26, %v745_v21  ;;  %v494_v36 = vrot.slane %v492_v46, 7  ;;  %v501_v37 = vrot.slane %v499_v0, 7  ;;  %v2987_v51 = vcombine.low %v618_v10, %v4104_v35 }
 0x1b5   :  { %v768_v47 = vrot.slane %v766_v30, 5  ;;  %3320 = vmatprep.mubr.msk.bf16.mxu1 %vm264_vm0, %v2986_v9  ;;  %v502_v53 = vshll.u32 %v3097_v38, 16  ;;  %v383_v58 = vmul.f32 %v4009_v42, %v3914_v39  ;;  %v398_v62 = vmax.f32 %v382_v50, 0.0 }
 0x1b6   :  { %v750_v56 = vrot.slane %v749_v32, 4  ;;  %v497_v1 = vor.u32 %v495_v23, %v494_v36  ;;  %v4113_v14 = vcombine.low %v4104_v35, %v4104_v35  ;;  %3321 = vmatmul.mubr.msk.bf16.vlgmr.msra.gmra.mrb[0].mxu1 %vm264_vm0, %v2987_v51  ;;  %v384_v0 = vmul.f32 %v4009_v42, %v3916_v44 }
 0x1b7   :  { %v504_v46 = vor.u32 %v502_v53, %v501_v37  ;;  %v385_v38 = vmul.f32 %v4009_v42, %v3918_v11  ;;  %3337 = vmatpush3.bf16.msra.mxu1 %v3877_v6  ;;  %v399_v39 = vmax.f32 %v383_v58, 0.0  ;;  %v3098_v50 = vpack.c.bf16 %v398_v62, %v398_v62 }
 0x1b8   :  { %v600_v10 = vsel %vm3954_vm3, 0, %v497_v1  ;;  %v735_v15 = vor.u32 %v734_v24, %v731_v8  ;;  %v400_v18 = vmax.f32 %v384_v0, 0.0  ;;  %3338 = vmatprep.subr.bf16.mxu1 %v3606_v55  ;;  %v4133_v6 = vsel %vm4031_vm12, %v750_v56, %v754_v27 }
 0x1b9   :  { %v601_v16 = vsel %vm3954_vm3, 0, %v504_v46  ;;  %v4127_v17 = vsel %vm3964_vm6, %v600_v10, 0  ;;  %v401_v44 = vmax.f32 %v385_v38, 0.0  ;;  %v3099_v8 = vpack.c.bf16 %v399_v39, %v399_v39 }
 0x1ba   :  { %v4137_v11 = vsel %vm3964_vm6, %v601_v16, 0  ;;  %v506_v21 = vshrl.u32 %v3098_v50, 16  ;;  %v4141_v22 = vcombine.low %v4127_v17, %v4127_v17  ;;  %v3100_v26 = vpack.c.bf16 %v400_v18, %v400_v18 }
 0x1bb   :  { %v4145_v23 = vcombine.low %v4137_v11, %v4137_v11  ;;  %v2988_v24 = vcombine.low %v4127_v17, %v4137_v11  ;;  %v509_v30 = vshll.u32 %v3098_v50, 16  ;;  %v513_v9 = vshrl.u32 %v3099_v8, 16  ;;  %3339 = vmatpush3.bf16.msra.mxu1 %v3606_v55 }
 0x1bc   :  { %v508_v27 = vrot.slane %v506_v21, 7  ;;  %v3101_v32 = vpack.c.bf16 %v401_v44, %v401_v44  ;;  %v516_v36 = vshll.u32 %v3099_v8, 16  ;;  %v520_v37 = vshrl.u32 %v3100_v26, 16  ;;  %3356 = vmatprep.subr.bf16.mxu1 %v4129_v19 }
 0x1bd   :  { %3324 = vmatprep.mubr.msk.bf16.mxu1 %vm264_vm0, %v2988_v24  ;;  %v736_v51 = vrot.slane %v735_v15, 4  ;;  %v763_v53 = vor.u32 %v762_v29, %v759_v28  ;;  %v515_v1 = vrot.slane %v513_v9, 7  ;;  %v523_v58 = vshll.u32 %v3100_v26, 16 }
 0x1be   :  { %v511_v56 = vor.u32 %v509_v30, %v508_v27  ;;  %v527_v62 = vshrl.u32 %v3101_v32, 16  ;;  %v522_v46 = vrot.slane %v520_v37, 7  ;;  %v530_v0 = vshll.u32 %v3101_v32, 16 }
 0x1bf   :  { %v4154_v38 = vsel %vm4031_vm12, %v736_v51, %v4098_v25  ;;  %v764_v55 = vrot.slane %v763_v53, 4  ;;  %v518_v10 = vor.u32 %v516_v36, %v515_v1  ;;  %v4170_v25 = vcombine.high %v4104_v35, %v4104_v35 }
 0x1c0   :  { %v602_v39 = vsel %vm3954_vm3, 0, %v511_v56  ;;  %v529_v50 = vrot.slane %v527_v62, 7  ;;  %v2917_v28 = vcombine.low %v4041_v5, %v4154_v38  ;;  %v525_v15 = vor.u32 %v523_v58, %v522_v46 }
 0x1c1   :  { %v4162_v29 = vsel %vm3964_vm6, %v602_v39, 0  ;;  %v4166_v16 = vsel %vm4031_vm12, %v764_v55, %v768_v47  ;;  %v603_v18 = vsel %vm3954_vm3, 0, %v518_v10  ;;  %v4181_v21 = vcombine.high %v4127_v17, %v4127_v17  ;;  %v3609_v47 = vld [vmem:[#allocation7 + $0x8] sm:$0xff]   ;;  %v4223_v55 = vld [vmem:[#allocation7 + $0x20] sm:$0xff]  }
 0x1c2   :  { %v532_v44 = vor.u32 %v530_v0, %v529_v50  ;;  %3260 = vmatprep.mubr.msk.bf16.mxu0 %vm264_vm0, %v2917_v28  ;;  %v4177_v8 = vcombine.low %v4133_v6, %v4166_v16  ;;  %v4185_v24 = vsel %vm3964_vm6, %v603_v18, 0  ;;  %v604_v26 = vsel %vm3954_vm3, 0, %v525_v15  ;;  %4933 = vst [vmem:[#allocation18_spill] sm:$0xff] %v4223_v55 }
 0x1c3   :  { %v771_v27 = vshrl.u32 %v4113_v14, 16  ;;  %v774_v30 = vshll.u32 %v4113_v14, 16  ;;  %v4193_v9 = vcombine.low %v4162_v29, %v4162_v29  ;;  %v2989_v32 = vcombine.low %v4162_v29, %v4185_v24 }
 0x1c4   :  { %4930 = vst [vmem:[#allocation15_spill] sm:$0xff] %v4177_v8  ;;  %v605_v36 = vsel %vm3954_vm3, 0, %v532_v44  ;;  %v4201_v37 = vsel %vm3964_vm6, %v604_v26, 0  ;;  %3261 = vmatmul.mubr.msk.bf16.vlgmr.msra.gmra.mrb[16].mxu0 %vm264_vm0, %v4177_v8  ;;  %v4207_v51 = vcombine.low %v4185_v24, %v4185_v24  ;;  %v780_v46 = vshll.u32 %v4170_v25, 16 }
 0x1c5   :  { %4931 = vst [vmem:[#allocation16_spill] sm:$0xff] %v4201_v37  ;;  %v4211_v53 = vsel %vm3964_vm6, %v605_v36, 0  ;;  %v773_v56 = vrot.slane %v771_v27, 4  ;;  %v776_v1 = vrot.slane %v774_v30, 5  ;;  %3277 = vmatpush3.bf16.msra.mxu0 %v3980_v52  ;;  %3325 = vmatmul.mubr.msk.bf16.gmra.mrb[4].mxu1 %vm264_vm0, %v2989_v32  ;;  %v4217_v58 = vcombine.low %v4201_v37, %v4201_v37 }
 0x1c6   :  { %v2990_v62 = vcombine.low %v4201_v37, %v4211_v53  ;;  %v785_v0 = vshrl.u32 %v4141_v22, 16  ;;  %3278 = vmatprep.subr.bf16.mxu0 %v3609_v47  ;;  %v788_v39 = vshll.u32 %v4141_v22, 16  ;;  %v794_v52 = vshll.u32 %v4181_v21, 16 }
 0x1c7   :  { %4932 = vst [vmem:[#allocation17_spill] sm:$0xff] %v4217_v58  ;;  %v777_v10 = vor.u32 %v776_v1, %v773_v56  ;;  %v386_v50 = vmul.f32 %v4009_v42, %v3920_v43  ;;  %v4231_v28 = vcombine.low %v4211_v53, %v4211_v53  ;;  %v403_v18 = vmax.f32 %v4013_v48, 0.0 }
 0x1c8   :  { %3328 = vmatprep.mubr.msk.bf16.mxu1 %vm264_vm0, %v2990_v62  ;;  %v787_v15 = vrot.slane %v785_v0, 4  ;;  %v548_v44 = vshrl.u32 %v4045_v7, 16  ;;  %v782_v27 = vrot.slane %v780_v46, 5  ;;  %v790_v30 = vrot.slane %v788_v39, 5 }
 0x1c9   :  { %4934 = vst [vmem:[#allocation19_spill] sm:$0xff] %v4231_v28  ;;  %v778_v26 = vrot.slane %v777_v10, 4  ;;  %v402_v32 = vmax.f32 %v386_v50, 0.0  ;;  %3279 = vmatpush3.bf16.msra.mxu0 %v3609_v47  ;;  %v3103_v36 = vpack.c.bf16 %v403_v18, %v403_v18  ;;  %v551_v43 = vshll.u32 %v4045_v7, 16 }
 0x1ca   :  { %v550_v56 = vrot.slane %v548_v44, 7  ;;  %v4243_v42 = vsel %vm3964_vm6, %v609_v45, 0  ;;  %3296 = vmatprep.subr.bf16.mxu0 %v4223_v55  ;;  %v791_v1 = vor.u32 %v790_v30, %v787_v15  ;;  %v796_v47 = vrot.slane %v794_v52, 5 }
 0x1cb   :  { %v4248_v48 = vsel %vm4031_vm12, %v778_v26, %v782_v27  ;;  %v3102_v62 = vpack.c.bf16 %v402_v32, %v402_v32  ;;  %v541_v46 = vshrl.u32 %v3103_v36, 16  ;;  %v544_v0 = vshll.u32 %v3103_v36, 16 }
 0x1cc   :  { %v553_v7 = vor.u32 %v551_v43, %v550_v56  ;;  %v4252_v10 = vcombine.low %v4243_v42, %v4243_v42  ;;  %v792_v31 = vrot.slane %v791_v1, 4  ;;  %v4256_v50 = vcombine.high %v4137_v11, %v4137_v11 }
 0x1cd   :  { %v534_v39 = vshrl.u32 %v3102_v62, 16  ;;  %v537_v45 = vshll.u32 %v3102_v62, 16  ;;  %v543_v18 = vrot.slane %v541_v46, 7  ;;  %v4262_v52 = vcombine.high %v4162_v29, %v4162_v29 }
 0x1ce   :  { %4935 = vst [vmem:[#allocation20_spill] sm:$0xff] %v4252_v10  ;;  %v608_v15 = vsel %vm3954_vm3, 0, %v553_v7  ;;  %v799_v44 = vshrl.u32 %v4145_v23, 16  ;;  %v4267_v26 = vsel %vm4031_vm12, %v792_v31, %v796_v47  ;;  %v802_v32 = vshll.u32 %v4145_v23, 16 }
 0x1cf   :  { %v536_v27 = vrot.slane %v534_v39, 7  ;;  %v4271_v30 = vsel %vm3964_vm6, %v608_v15, 0  ;;  %v4276_v36 = vcombine.low %v4248_v48, %v4267_v26  ;;  %v546_v43 = vor.u32 %v544_v0, %v543_v18 }
 0x1d0   :  { %v2992_v1 = vcombine.low %v4271_v30, %v4243_v42  ;;  %v801_v62 = vrot.slane %v799_v44, 4  ;;  %v804_v46 = vrot.slane %v802_v32, 5  ;;  %v808_v7 = vshll.u32 %v4256_v50, 16 }
 0x1d1   :  { %4936 = vst [vmem:[#allocation21_spill] sm:$0xff] %v4276_v36  ;;  %v539_v47 = vor.u32 %v537_v45, %v536_v27  ;;  %3264 = vmatprep.mubr.msk.bf16.mxu0 %vm264_vm0, %v4276_v36  ;;  %v607_v31 = vsel %vm3954_vm3, 0, %v546_v43  ;;  %v813_v39 = vshrl.u32 %v4193_v9, 16  ;;  %v816_v15 = vshll.u32 %v4193_v9, 16 }
 0x1d2   :  { %v822_v0 = vshll.u32 %v4262_v52, 16  ;;  %v4294_v45 = vsel %vm3964_vm6, %v607_v31, 0  ;;  %v805_v44 = vor.u32 %v804_v46, %v801_v62  ;;  %v810_v27 = vrot.slane %v808_v7, 5 }
 0x1d3   :  { %v606_v18 = vsel %vm3954_vm3, 0, %v539_v47  ;;  %v4302_v43 = vcombine.low %v4294_v45, %v4294_v45  ;;  %v815_v34 = vrot.slane %v813_v39, 4  ;;  %v818_v56 = vrot.slane %v816_v15, 5 }
 0x1d4   :  { %v4298_v32 = vsel %vm3964_vm6, %v606_v18, 0  ;;  %v806_v31 = vrot.slane %v805_v44, 4  ;;  %v824_v62 = vrot.slane %v822_v0, 5  ;;  %v4312_v7 = vcombine.high %v4201_v37, %v4201_v37 }
 0x1d5   :  { %4937 = vst [vmem:[#allocation22_spill] sm:$0xff] %v4302_v43  ;;  %v4306_v36 = vcombine.low %v4298_v32, %v4298_v32  ;;  %v2991_v47 = vcombine.low %v4298_v32, %v4294_v45  ;;  %v819_v46 = vor.u32 %v818_v56, %v815_v34  ;;  %v827_v18 = vshrl.u32 %v4217_v58, 16 }
 0x1d6   :  { %4939 = vst [vmem:[#allocation24_spill] sm:$0xff] %v4312_v7  ;;  %v830_v8 = vshll.u32 %v4217_v58, 16  ;;  %v4319_v39 = vsel %vm4031_vm12, %v806_v31, %v810_v27  ;;  %v407_v15 = vmax.f32 %v4023_v54, 0.0  ;;  %v562_v44 = vshrl.u32 %v4049_v41, 16  ;;  %v3610_v58 = vld [vmem:[#allocation7 + $0x58] sm:$0xff]  }
 0x1d7   :  { %4938 = vst [vmem:[#allocation23_spill] sm:$0xff] %v4306_v36  ;;  %3329 = vmatmul.mubr.msk.bf16.gmra.mrb[8].mxu1 %vm264_vm0, %v2991_v47  ;;  %v565_v34 = vshll.u32 %v4049_v41, 16  ;;  %v820_v56 = vrot.slane %v819_v46, 4  ;;  %v829_v0 = vrot.slane %v827_v18, 4  ;;  %v836_v61 = vshll.u32 %v4312_v7, 16 }
 0x1d8   :  { %3332 = vmatprep.mubr.msk.bf16.mxu1 %vm264_vm0, %v2992_v1  ;;  %v832_v4 = vrot.slane %v830_v8, 5  ;;  %v3107_v37 = vpack.c.bf16 %v407_v15, %v407_v15  ;;  %v564_v55 = vrot.slane %v562_v44, 7  ;;  %v3008_v47 = vcombine.low %v4154_v38, %v4133_v6 }
 0x1d9   :  { %v4330_v27 = vcombine.high %v4211_v53, %v4211_v53  ;;  %v4334_v54 = vsel %vm4031_vm12, %v820_v56, %v824_v62  ;;  %v838_v1 = vrot.slane %v836_v61, 5  ;;  %v4338_v8 = vcombine.high %v4298_v32, %v4298_v32 }
 0x1da   :  { %v833_v41 = vor.u32 %v832_v4, %v829_v0  ;;  %v4342_v31 = vcombine.low %v4319_v39, %v4334_v54  ;;  %v567_v46 = vor.u32 %v565_v34, %v564_v55  ;;  %v569_v6 = vshrl.u32 %v3107_v37, 16 }
 0x1db   :  { %4940 = vst [vmem:[#allocation25_spill] sm:$0xff] %v4330_v27  ;;  %4941 = vst [vmem:[#allocation26_spill] sm:$0xff] %v4338_v8  ;;  %v572_v38 = vshll.u32 %v3107_v37, 16  ;;  %v841_v15 = vshrl.u32 %v4231_v28, 16  ;;  %v844_v44 = vshll.u32 %v4231_v28, 16  ;;  %v850_v62 = vshll.u32 %v4330_v27, 16 }
 0x1dc   :  { %4942 = vst [vmem:[#allocation27_spill] sm:$0xff] %v4342_v31  ;;  %v834_v18 = vrot.slane %v833_v41, 4  ;;  %3265 = vmatmul.mubr.msk.bf16.gmra.mrb[20].mxu0 %vm264_vm0, %v4342_v31  ;;  %v571_v61 = vrot.slane %v569_v6, 7  ;;  %v610_v4 = vsel %vm3954_vm3, 0, %v567_v46  ;;  %v855_v56 = vshrl.u32 %v4306_v36, 16 }
 0x1dd   :  { %v858_v55 = vshll.u32 %v4306_v36, 16  ;;  %v4359_v34 = vsel %vm3964_vm6, %v610_v4, 0  ;;  %v843_v0 = vrot.slane %v841_v15, 4  ;;  %v846_v41 = vrot.slane %v844_v44, 5 }
 0x1de   :  { %v4355_v37 = vsel %vm4031_vm12, %v834_v18, %v838_v1  ;;  %v4363_v6 = vcombine.low %v4271_v30, %v4271_v30  ;;  %v574_v31 = vor.u32 %v572_v38, %v571_v61  ;;  %v4369_v36 = vcombine.low %v4359_v34, %v4359_v34 }
 0x1df   :  { %v2921_v46 = vcombine.low %v4041_v5, %v4355_v37  ;;  %v847_v1 = vor.u32 %v846_v41, %v843_v0  ;;  %v857_v18 = vrot.slane %v855_v56, 4  ;;  %v860_v27 = vrot.slane %v858_v55, 5 }
 0x1e0   :  { %4943 = vst [vmem:[#allocation28_spill] sm:$0xff] %v4363_v6  ;;  %v864_v4 = vshll.u32 %v4338_v8, 16  ;;  %v611_v15 = vsel %vm3954_vm3, 0, %v574_v31  ;;  %v852_v44 = vrot.slane %v850_v62, 5  ;;  %v4377_v28 = vcombine.high %v4294_v45, %v4294_v45 }
 0x1e1   :  { %3268 = vmatprep.mubr.msk.bf16.mxu0 %vm264_vm0, %v2921_v46  ;;  %v869_v38 = vshrl.u32 %v4302_v43, 16  ;;  %v4382_v61 = vsel %vm3964_vm6, %v611_v15, 0  ;;  %v848_v56 = vrot.slane %v847_v1, 4  ;;  %v861_v55 = vor.u32 %v860_v27, %v857_v18 }
 0x1e2   :  { %4944 = vst [vmem:[#allocation29_spill] sm:$0xff] %v4377_v28  ;;  %v4386_v0 = vcombine.high %v4271_v30, %v4271_v30  ;;  %v2993_v33 = vcombine.low %v4359_v34, %v4382_v61  ;;  %v866_v31 = vrot.slane %v864_v4, 5  ;;  %v872_v41 = vshll.u32 %v4302_v43, 16 }
 0x1e3   :  { %v871_v62 = vrot.slane %v869_v38, 4  ;;  %v4393_v46 = vsel %vm4031_vm12, %v848_v56, %v852_v44  ;;  %v862_v40 = vrot.slane %v861_v55, 4  ;;  %v878_v15 = vshll.u32 %v4377_v28, 16 }
 0x1e4   :  { %4945 = vst [vmem:[#allocation30_spill] sm:$0xff] %v4386_v0  ;;  %v883_v27 = vshrl.u32 %v4363_v6, 16  ;;  %3333 = vmatmul.mubr.msk.bf16.gmra.mrb[12].mxu1 %vm264_vm0, %v2993_v33  ;;  %v4400_v1 = vcombine.low %v4382_v61, %v4382_v61  ;;  %v874_v18 = vrot.slane %v872_v41, 5  ;;  %v886_v4 = vshll.u32 %v4363_v6, 16 }
 0x1e5   :  { %v3010_v38 = vcombine.low %v4267_v26, %v4319_v39  ;;  %3340 = vmatprep.mubr.msk.bf16.mxu1 %vm264_vm0, %v3008_v47  ;;  %v4408_v44 = vsel %vm4031_vm12, %v862_v40, %v866_v31  ;;  %v892_v55 = vshll.u32 %v4386_v0, 16  ;;  %v4413_v33 = vcombine.high %v4243_v42, %v4243_v42 }
 0x1e6   :  { %v885_v56 = vrot.slane %v883_v27, 4  ;;  %v4417_v41 = vcombine.low %v4393_v46, %v4408_v44  ;;  %v875_v5 = vor.u32 %v874_v18, %v871_v62  ;;  %v880_v6 = vrot.slane %v878_v15, 5 }
 0x1e7   :  { %4946 = vst [vmem:[#allocation31_spill] sm:$0xff] %v4413_v33  ;;  %v888_v26 = vrot.slane %v886_v4, 5  ;;  %v4421_v39 = vcombine.high %v4359_v34, %v4359_v34  ;;  %v897_v47 = vshrl.u32 %v4252_v10, 16  ;;  %v900_v31 = vshll.u32 %v4252_v10, 16 }
 0x1e8   :  { %4947 = vst [vmem:[#allocation32_spill] sm:$0xff] %v4417_v41  ;;  %v906_v40 = vshll.u32 %v4413_v33, 16  ;;  %3269 = vmatmul.mubr.msk.bf16.gmra.mrb[24].mxu0 %vm264_vm0, %v4417_v41  ;;  %v876_v27 = vrot.slane %v875_v5, 4  ;;  %v911_v28 = vshrl.u32 %v4369_v36, 16  ;;  %v914_v62 = vshll.u32 %v4369_v36, 16 }
 0x1e9   :  { %v889_v0 = vor.u32 %v888_v26, %v885_v56  ;;  %v894_v15 = vrot.slane %v892_v55, 5  ;;  %v899_v18 = vrot.slane %v897_v47, 4  ;;  %v902_v4 = vrot.slane %v900_v31, 5 }
 0x1ea   :  { %v920_v43 = vshll.u32 %v4421_v39, 16  ;;  %v4433_v8 = vsel %vm4031_vm12, %v876_v27, %v880_v6  ;;  %v913_v33 = vrot.slane %v911_v28, 4  ;;  %v916_v7 = vrot.slane %v914_v62, 5  ;;  %v4462_v27 = vld [vmem:[#allocation7 + $0x60] sm:$0xff]  }
 0x1eb   :  { %v890_v10 = vrot.slane %v889_v0, 4  ;;  %v903_v41 = vor.u32 %v902_v4, %v899_v18  ;;  %v908_v5 = vrot.slane %v906_v40, 5  ;;  %v4437_v26 = vcombine.high %v4185_v24, %v4185_v24 }
 0x1ec   :  { %v922_v56 = vrot.slane %v920_v43, 5  ;;  %v4948_v47 = vcombine.low %v4166_v16, %v4248_v48  ;;  %v917_v6 = vor.u32 %v916_v7, %v913_v33  ;;  %v1639_v28 = vshrl.u32 %v4207_v51, 16 }
 0x1ed   :  { %v4441_v55 = vsel %vm4031_vm12, %v890_v10, %v894_v15  ;;  %v1642_v0 = vshll.u32 %v4207_v51, 16  ;;  %v904_v10 = vrot.slane %v903_v41, 4  ;;  %v1648_v31 = vshll.u32 %v4437_v26, 16 }
 0x1ee   :  { %3341 = vmatmul.mubr.msk.bf16.vlgmr.msra.gmra.mrb[0].mxu1 %vm264_vm0, %v4948_v47  ;;  %v4451_v43 = vcombine.low %v4433_v8, %v4441_v55  ;;  %v3012_v16 = vcombine.low %v4355_v37, %v4393_v46  ;;  %v918_v48 = vrot.slane %v917_v6, 4  ;;  %v1641_v7 = vrot.slane %v1639_v28, 4 }
 0x1ef   :  { %3357 = vmatpush3.bf16.msra.mxu1 %v4129_v19  ;;  %3344 = vmatprep.mubr.msk.bf16.mxu1 %vm264_vm0, %v3010_v38  ;;  %v1644_v33 = vrot.slane %v1642_v0, 5  ;;  %v4460_v40 = vcombine.low %v4104_v35, %v4127_v17  ;;  %v1239_v19 = vrot.slane %v4080_v3, 5  ;;  %v4469_v38 = vsel %vm4031_vm12, %v904_v10, %v908_v5 }
 0x1f0   :  { %3358 = vmatprep.subr.bf16.mxu1 %v3610_v58  ;;  %3272 = vmatprep.mubr.msk.bf16.mxu0 %vm264_vm0, %v4451_v43  ;;  %v3013_v37 = vcombine.low %v4408_v44, %v4433_v8  ;;  %v4475_v46 = vcombine.low %v4137_v11, %v4162_v29  ;;  %v4479_v35 = vsel %vm4031_vm12, %v918_v48, %v922_v56  ;;  %v1653_v29 = vshrl.u32 %v4400_v1, 16  ;;  %v4963_v44 = vld [vmem:[#allocation31_spill] sm:$0xff] }
 0x1f1   :  { %v2935_v3 = vcombine.low %v3975_v49, %v4064_v57  ;;  %v1645_v17 = vor.u32 %v1644_v33, %v1641_v7  ;;  %v3014_v41 = vcombine.low %v4441_v55, %v4469_v38  ;;  %v4487_v62 = vcombine.low %v4469_v38, %v4479_v35 }
 0x1f2   :  { %v4491_v11 = vcombine.high %v4382_v61, %v4382_v61  ;;  %v1656_v15 = vshll.u32 %v4400_v1, 16  ;;  %v1650_v4 = vrot.slane %v1648_v31, 5  ;;  %v2954_v57 = vrot.slane %v4072_v13, 9 }
 0x1f3   :  { %3359 = vmatpush3.bf16.msra.mxu1 %v3610_v58  ;;  %v1646_v18 = vrot.slane %v1645_v17, 4  ;;  %v2955_v5 = vrot.slane %v4078_v60, 9  ;;  %3273 = vmatmul.mubr.msk.bf16.gmra.mrb[28].mxu0 %vm264_vm0, %v4487_v62  ;;  %v1655_v58 = vrot.slane %v1653_v29, 4  ;;  %v4949_v28 = vrot.slane %v4076_v59, 5 }
 0x1f4   :  { %3376 = vmatprep.subr.bf16.mxu1 %v4462_v27  ;;  %v1658_v56 = vrot.slane %v1656_v15, 5  ;;  %v1662_v47 = vshll.u32 %v4491_v11, 16  ;;  %3280 = vmatprep.mubr.msk.bf16.mxu0 %vm264_vm0, %v2935_v3  ;;  %v2957_v0 = vrot.slane %v4113_v14, 9  ;;  %v1247_v7 = vrot.slane %v4170_v25, 5  ;;  %v4950_v15 = vld [vmem:[#allocation17_spill] sm:$0xff] }
 0x1f5   :  { %v4504_v6 = vsel %vm4031_vm12, %v1646_v18, %v1650_v4  ;;  %v4510_v13 = vsel %vm3996_vm9, %v2954_v57, %v4949_v28  ;;  %v4514_v60 = vsel %vm3996_vm9, %v2955_v5, %v1239_v19  ;;  %v4524_v33 = vcombine.low %v4211_v53, %v4298_v32  ;;  %v4951_v18 = vld [vmem:[#allocation18_spill] sm:$0xff]  ;;  %v4953_v57 = vld [vmem:[#allocation19_spill] sm:$0xff] }
 0x1f6   :  { %v3011_v10 = vcombine.low %v4334_v54, %v4504_v6  ;;  %v1659_v31 = vor.u32 %v1658_v56, %v1655_v58  ;;  %v1664_v48 = vrot.slane %v1662_v47, 5  ;;  %v3028_v59 = vcombine.low %v4510_v13, %v4514_v60  ;;  %v4954_v58 = vld [vmem:[#allocation25_spill] sm:$0xff]  ;;  %v4956_v28 = vld [vmem:[#allocation23_spill] sm:$0xff] }
 0x1f7   :  { %v4529_v14 = vcombine.low %v4294_v45, %v4271_v30  ;;  %v2958_v54 = vrot.slane %v4141_v22, 9  ;;  %v1251_v3 = vrot.slane %v4181_v21, 5  ;;  %v4536_v25 = vsel %vm3996_vm9, %v2957_v0, %v1247_v7  ;;  %v3613_v45 = vld [vmem:[#allocation7 + $0x28] sm:$0xff]  }
 0x1f8   :  { %3345 = vmatmul.mubr.msk.bf16.gmra.mrb[4].mxu1 %vm264_vm0, %v3011_v10  ;;  %v1660_v19 = vrot.slane %v1659_v31, 4  ;;  %v2959_v53 = vrot.slane %v4145_v23, 9  ;;  %v1255_v32 = vrot.slane %v4256_v50, 5  ;;  %v4542_v17 = vcombine.low %v4243_v42, %v4359_v34  ;;  %v4957_v10 = vld [vmem:[#allocation26_spill] sm:$0xff] }
 0x1f9   :  { %3348 = vmatprep.mubr.msk.bf16.mxu1 %vm264_vm0, %v3012_v16  ;;  %v4550_v22 = vsel %vm3996_vm9, %v2958_v54, %v1251_v3  ;;  %v2968_v21 = vcombine.low %v4005_v20, %v4510_v13  ;;  %v2960_v42 = vrot.slane %v4193_v9, 9  ;;  %v1259_v12 = vrot.slane %v4262_v52, 5  ;;  %v4952_v52 = vld [vmem:[#allocation24_spill] sm:$0xff]  ;;  %v4958_v54 = vld [vmem:[#allocation22_spill] sm:$0xff]  ;;  %v3616_v13 = vld [vmem:[#allocation7 + $0x78] sm:$0xff]  }
 0x1fa   :  { %v4546_v30 = vsel %vm4031_vm12, %v1660_v19, %v1664_v48  ;;  %v4558_v50 = vsel %vm3996_vm9, %v2959_v53, %v1255_v32  ;;  %v3026_v16 = vrot.slane %v4207_v51, 9  ;;  %v1832_v29 = vrot.slane %v4437_v26, 5  ;;  %v4955_v51 = vld [vmem:[#allocation16_spill] sm:$0xff] }
 0x1fb   :  { %v3015_v23 = vcombine.low %v4479_v35, %v4546_v30  ;;  %3281 = vmatmul.mubr.msk.bf16.vlgmr.msra.gmra.mrb[16].mxu0 %vm264_vm0, %v4086_v63  ;;  %v3030_v34 = vcombine.low %v4550_v22, %v4558_v50  ;;  %v2961_v35 = vrot.slane %v4950_v15, 9  ;;  %v4574_v9 = vsel %vm3996_vm9, %v2960_v42, %v1259_v12  ;;  %v4960_v12 = vld [vmem:[#allocation28_spill] sm:$0xff] }
 0x1fc   :  { %3284 = vmatprep.mubr.msk.bf16.mxu0 %vm264_vm0, %v4460_v40  ;;  %3297 = vmatpush3.bf16.msra.mxu0 %v4951_v18  ;;  %v1263_v4 = vrot.slane %v4952_v52, 5  ;;  %v2962_v5 = vrot.slane %v4953_v57, 9  ;;  %v1267_v56 = vrot.slane %v4954_v58, 5  ;;  %v2939_v26 = vcombine.low %v3975_v49, %v4955_v51 }
 0x1fd   :  { %3298 = vmatprep.subr.bf16.mxu0 %v3613_v45  ;;  %v4583_v47 = vcombine.low %v4536_v25, %v4550_v22  ;;  %v2963_v0 = vrot.slane %v4956_v28, 9  ;;  %v1271_v31 = vrot.slane %v4957_v10, 5  ;;  %v4589_v48 = vsel %vm3996_vm9, %v3026_v16, %v1832_v29  ;;  %v4959_v22 = vld [vmem:[#allocation29_spill] sm:$0xff]  ;;  %v4961_v29 = vld [vmem:[#allocation30_spill] sm:$0xff] }
 0x1fe   :  { %v1264_v7 = vsel %vm3996_vm9, %v2961_v35, %v1263_v4  ;;  %v1268_v19 = vsel %vm3996_vm9, %v2962_v5, %v1267_v56  ;;  %v2964_v3 = vrot.slane %v4958_v54, 9  ;;  %v1275_v42 = vrot.slane %v4959_v22, 5  ;;  %v4962_v35 = vld [vmem:[#allocation20_spill] sm:$0xff] }
 0x1ff   :  { %v3032_v53 = vcombine.low %v1264_v7, %v1268_v19  ;;  %v1272_v32 = vsel %vm3996_vm9, %v2963_v0, %v1271_v31  ;;  %v2965_v16 = vrot.slane %v4960_v12, 9  ;;  %v1279_v15 = vrot.slane %v4961_v29, 5  ;;  %v4964_v0 = vld [vmem:[#allocation13_spill] sm:$0xff]  ;;  %v4965_v31 = vld [vmem:[#allocation14_spill] sm:$0xff]  ;;  %v3620_v29 = vld [vmem:[%s4895_s4 + $0x8] sm:$0xff]  }
 0x200   :  { %3349 = vmatmul.mubr.msk.bf16.gmra.mrb[8].mxu1 %vm264_vm0, %v3013_v37  ;;  %3299 = vmatpush3.bf16.msra.mxu0 %v3613_v45  ;;  %v2966_v8 = vrot.slane %v4962_v35, 9  ;;  %v1283_v37 = vrot.slane %v4963_v44, 5  ;;  %v4613_v18 = vcombine.low %v4558_v50, %v4574_v9  ;;  %v1276_v52 = vsel %vm3996_vm9, %v2964_v3, %v1275_v42  ;;  %v3614_v3 = vld [vmem:[#allocation7 + $0x68] sm:$0xff]  }
 0x201   :  { %3352 = vmatprep.mubr.msk.bf16.mxu1 %vm264_vm0, %v3014_v41  ;;  %v2972_v4 = vcombine.low %v4005_v20, %v1264_v7  ;;  %v2967_v55 = vrot.slane %v4369_v36, 9  ;;  %v1287_v38 = vrot.slane %v4421_v39, 5  ;;  %v3033_v41 = vcombine.low %v1272_v32, %v1276_v52 }
 0x202   :  { %v1280_v45 = vsel %vm3996_vm9, %v2965_v16, %v1279_v15  ;;  %v1284_v57 = vsel %vm3996_vm9, %v2966_v8, %v1283_v37  ;;  %v3027_v5 = vrot.slane %v4400_v1, 9  ;;  %v1836_v36 = vrot.slane %v4491_v11, 5 }
 0x203   :  { %3285 = vmatmul.mubr.msk.bf16.gmra.mrb[20].mxu0 %vm264_vm0, %v4475_v46  ;;  %v3034_v50 = vcombine.low %v1280_v45, %v1284_v57  ;;  %v1288_v58 = vsel %vm3996_vm9, %v2967_v55, %v1287_v38  ;;  %v4630_v56 = vcombine.low %v1268_v19, %v1272_v32  ;;  %v4633_v39 = vcombine.low %v1276_v52, %v1280_v45 }
 0x204   :  { %3288 = vmatprep.mubr.msk.bf16.mxu0 %vm264_vm0, %v2939_v26  ;;  %v4635_v51 = vcombine.low %v1284_v57, %v1288_v58  ;;  %v4639_v1 = vsel %vm3996_vm9, %v3027_v5, %v1836_v36  ;;  %v3070_v28 = vcombine.low %v4589_v48, %v4005_v20  ;;  %v2956_v10 = vrot.slane %v4964_v0, 9 }
 0x205   :  { %v1243_v7 = vrot.slane %v4965_v31, 5  ;;  %v3035_v11 = vcombine.low %v1288_v58, %v4639_v1  ;;  %v3071_v26 = vcombine.low %v4639_v1, %v4005_v20  ;;  %v3031_v2 = vcombine.low %v4574_v9, %v4589_v48  ;;  %v3619_v20 = vld [vmem:[%s4895_s4] sm:$0xff]   ;;  %s3745_s4 = smov [#allocation8]  }
 0x206   :  { %3436 = vmatprep.subr.bf16.mxu0 %v3619_v20  ;;  %s2850_s26 = sshll.u32 %s3745_s4, 4  ;;  %s2851_s26 = int_to_ptr.vmem [resolvable:$true] %s2850_s26 }
 0x207   :  { %v1244_v19 = vsel %vm3996_vm9, %v2956_v10, %v1243_v7  ;;  %s3709_s27 = scalar_lea.vmem %s2851_s26, 2048  ;;  %p3714_p11 = scmp.lt.s32.totalorder %s2851_s26, %s2851_s26 }
 0x208   :  { %3353 = vmatmul.mubr.msk.bf16.gmra.mrb[12].mxu1 %vm264_vm0, %v3015_v23  ;;  %v3029_v54 = vcombine.low %v1244_v19, %v4536_v25  ;;  %v4967_v25 = vld [vmem:[#allocation21_spill] sm:$0xff]  ;;  %p3710_p10 = scmp.ne.s32.totalorder %s2851_s26, %s3709_s27  ;;  %p3715_p12 = scmp.lt.s32.totalorder %s3709_s27, %s3709_s27 }
 0x209   :  { %3360 = vmatprep.mubr.msk.bf16.mxu1 %vm264_vm0, %v3028_v59  ;;  %v3615_v59 = vld [vmem:[#allocation7 + $0x70] sm:$0xff]  }
 0x20a   :  { %p3716_p13 = por %p3715_p12, %p3714_p11 }
 0x20b   :  { %3289 = vmatmul.mubr.msk.bf16.gmra.mrb[24].mxu0 %vm264_vm0, %v4524_v33 }
 0x20c   :  { %3292 = vmatprep.mubr.msk.bf16.mxu0 %vm264_vm0, %v4529_v14  ;;  %p3717_p0 = pnand %p3716_p13, %p3710_p10 }
 0x210   :  { %3361 = vmatmul.mubr.msk.bf16.vlgmr.msra.gmra.mrb[0].mxu1 %vm264_vm0, %v3029_v54 }
 0x211   :  { %3377 = vmatpush3.bf16.msra.mxu1 %v4462_v27  ;;  %3364 = vmatprep.mubr.msk.bf16.mxu1 %vm264_vm0, %v3030_v34  ;;  %v2969_v27 = vcombine.low %v4514_v60, %v1244_v19  ;;  %v3617_v60 = vld [vmem:[#allocation7 + $0x80] sm:$0xff]  }
 0x212   :  { %3378 = vmatprep.subr.bf16.mxu1 %v3614_v3 }
 0x213   :  { %3293 = vmatmul.mubr.msk.bf16.gmra.mrb[28].mxu0 %vm264_vm0, %v4542_v17 }
 0x214   :  { %3300 = vmatprep.mubr.msk.bf16.mxu0 %vm264_vm0, %v2968_v21 }
 0x215   :  { %3379 = vmatpush3.bf16.msra.mxu1 %v3614_v3 }
 0x216   :  { %3396 = vmatprep.subr.bf16.mxu1 %v3615_v59 }
 0x218   :  { %3365 = vmatmul.mubr.msk.bf16.gmra.mrb[4].mxu1 %vm264_vm0, %v3031_v2 }
 0x219   :  { %3368 = vmatprep.mubr.msk.bf16.mxu1 %vm264_vm0, %v3032_v53 }
 0x21b   :  { %3301 = vmatmul.mubr.msk.bf16.vlgmr.msra.gmra.mrb[16].mxu0 %vm264_vm0, %v2969_v27 }
 0x21c   :  { %3304 = vmatprep.mubr.msk.bf16.mxu0 %vm264_vm0, %v4583_v47  ;;  %3437 = vmatpush3.bf16.msra.mxu0 %v3619_v20 }
 0x21d   :  { %3438 = vmatprep.subr.bf16.mxu0 %v3620_v29 }
 0x220   :  { %3369 = vmatmul.mubr.msk.bf16.gmra.mrb[8].mxu1 %vm264_vm0, %v3033_v41  ;;  %3439 = vmatpush3.bf16.msra.mxu0 %v3620_v29 }
 0x221   :  { %3372 = vmatprep.mubr.msk.bf16.mxu1 %vm264_vm0, %v3034_v50 }
 0x223   :  { %3305 = vmatmul.mubr.msk.bf16.gmra.mrb[20].mxu0 %vm264_vm0, %v4613_v18 }
 0x224   :  { %3308 = vmatprep.mubr.msk.bf16.mxu0 %vm264_vm0, %v2972_v4 }
 0x228   :  { %3373 = vmatmul.mubr.msk.bf16.gmra.mrb[12].mxu1 %vm264_vm0, %v3035_v11 }
 0x229   :  { %3380 = vmatprep.mubr.msk.bf16.mxu1 %vm264_vm0, %v4086_v63  ;;  %v3046_v63 = vcombine.low %v4185_v24, %v3975_v49  ;;  %v3618_v24 = vld [vmem:[#allocation7 + $0x88] sm:$0xff]  }
 0x22b   :  { %3309 = vmatmul.mubr.msk.bf16.gmra.mrb[24].mxu0 %vm264_vm0, %v4630_v56 }
 0x22c   :  { %3312 = vmatprep.mubr.msk.bf16.mxu0 %vm264_vm0, %v4633_v39 }
 0x230   :  { %3381 = vmatmul.mubr.msk.bf16.vlgmr.msra.gmra.mrb[0].mxu1 %vm264_vm0, %v4460_v40  ;;  %v3047_v40 = vcombine.low %v4382_v61, %v3975_v49  ;;  %v4970_v49 = vld [vmem:[#allocation32_spill] sm:$0xff] }
 0x231   :  { %3397 = vmatpush3.bf16.msra.mxu1 %v3615_v59  ;;  %3384 = vmatprep.mubr.msk.bf16.mxu1 %vm264_vm0, %v4475_v46  ;;  %v4966_v46 = vld [vmem:[#allocation15_spill] sm:$0xff] }
 0x232   :  { %3398 = vmatprep.subr.bf16.mxu1 %v3616_v13 }
 0x233   :  { %3313 = vmatmul.mubr.msk.bf16.gmra.mrb[28].mxu0 %vm264_vm0, %v4635_v51 }
 0x235   :  { %3399 = vmatpush3.bf16.msra.mxu1 %v3616_v13 }
 0x236   :  { %3416 = vmatprep.subr.bf16.mxu1 %v3617_v60 }
 0x238   :  { %3385 = vmatmul.mubr.msk.bf16.gmra.mrb[4].mxu1 %vm264_vm0, %v3046_v63 }
 0x239   :  { %3388 = vmatprep.mubr.msk.bf16.mxu1 %vm264_vm0, %v4524_v33  ;;  %v4968_v33 = vld [vmem:[#allocation27_spill] sm:$0xff] }
 0x240   :  { %3389 = vmatmul.mubr.msk.bf16.gmra.mrb[8].mxu1 %vm264_vm0, %v4529_v14  ;;  %v4969_v14 = vld [vmem:[#allocation12_spill] sm:$0xff] }
 0x241   :  { %3392 = vmatprep.mubr.msk.bf16.mxu1 %vm264_vm0, %v4542_v17  ;;  %v3058_v17 = vcombine.low %v4504_v6, %v4969_v14  ;;  %v3059_v61 = vcombine.low %v4546_v30, %v4969_v14 }
 0x248   :  { %3393 = vmatmul.mubr.msk.bf16.gmra.mrb[12].mxu1 %vm264_vm0, %v3047_v40 }
 0x249   :  { %3400 = vmatprep.mubr.msk.bf16.mxu1 %vm264_vm0, %v4966_v46 }
 0x250   :  { %3401 = vmatmul.mubr.msk.bf16.vlgmr.msra.gmra.mrb[0].mxu1 %vm264_vm0, %v4967_v25 }
 0x251   :  { %3417 = vmatpush3.bf16.msra.mxu1 %v3617_v60  ;;  %3404 = vmatprep.mubr.msk.bf16.mxu1 %vm264_vm0, %v4968_v33 }
 0x252   :  { %3418 = vmatprep.subr.bf16.mxu1 %v3618_v24 }
 0x255   :  { %3419 = vmatpush3.bf16.msra.mxu1 %v3618_v24 }
 0x258   :  { %3405 = vmatmul.mubr.msk.bf16.gmra.mrb[4].mxu1 %vm264_vm0, %v3058_v17 }
 0x259   :  { %3408 = vmatprep.mubr.msk.bf16.mxu1 %vm264_vm0, %v4970_v49 }
 0x260   :  { %3409 = vmatmul.mubr.msk.bf16.gmra.mrb[8].mxu1 %vm264_vm0, %v4451_v43 }
 0x261   :  { %3412 = vmatprep.mubr.msk.bf16.mxu1 %vm264_vm0, %v4487_v62 }
 0x268   :  { %3413 = vmatmul.mubr.msk.bf16.gmra.mrb[12].mxu1 %vm264_vm0, %v3059_v61 }
 0x269   :  { %3420 = vmatprep.mubr.msk.bf16.mxu1 %vm264_vm0, %v2969_v27 }
 0x270   :  { %3421 = vmatmul.mubr.msk.bf16.vlgmr.msra.gmra.mrb[0].mxu1 %vm264_vm0, %v4583_v47 }
 0x271   :  { %3424 = vmatprep.mubr.msk.bf16.mxu1 %vm264_vm0, %v4613_v18 }
 0x278   :  { %3425 = vmatmul.mubr.msk.bf16.gmra.mrb[4].mxu1 %vm264_vm0, %v3070_v28 }
 0x279   :  { %3428 = vmatprep.mubr.msk.bf16.mxu1 %vm264_vm0, %v4630_v56 }
 0x280   :  { %3429 = vmatmul.mubr.msk.bf16.gmra.mrb[8].mxu1 %vm264_vm0, %v4633_v39 }
 0x281   :  { %3432 = vmatprep.mubr.msk.bf16.mxu1 %vm264_vm0, %v4635_v51 }
 0x288   :  { %3433 = vmatmul.mubr.msk.bf16.gmra.mrb[12].mxu1 %vm264_vm0, %v3071_v26 }
 0x2ee   :  { %v3302_v43 = vpop.f32.mrb[16].mxu0 }
 0x2ef   :  { %v1387_v62 = vpop.f32.mrb[17].mxu0 }
 0x2f0   :  { %v3303_v6 = vpop.f32.mrb[18].mxu0 }
 0x2f1   :  { %v1390_v30 = vpop.f32.mrb[19].mxu0 }
 0x2f6   :  { %v3306_v21 = vpop.f32.mrb[20].mxu0 }
 0x2f7   :  { %v1403_v23 = vpop.f32.mrb[21].mxu0 }
 0x2f8   :  { %v3307_v34 = vpop.f32.mrb[22].mxu0 }
 0x2f9   :  { %v1406_v9 = vpop.f32.mrb[23].mxu0 }
 0x2fe   :  { %v3310_v47 = vpop.f32.mrb[24].mxu0 }
 0x2ff   :  { %v1419_v48 = vpop.f32.mrb[25].mxu0 }
 0x300   :  { %v3311_v53 = vpop.f32.mrb[26].mxu0 }
 0x301   :  { %v1422_v32 = vpop.f32.mrb[27].mxu0 }
 0x306   :  { %v3314_v22 = vpop.f32.mrb[28].mxu0 }
 0x307   :  { %v1435_v42 = vpop.f32.mrb[29].mxu0 }
 0x308   :  { %v3315_v12 = vpop.f32.mrb[30].mxu0 }
 0x309   :  { %v1438_v16 = vpop.f32.mrb[31].mxu0 }
 0x343   :  { %v3422_v15 = vpop.f32.mrb[0].mxu1 }
 0x344   :  { %v4750_v35 = vadd.f32 %v3422_v15, %v3302_v43  ;;  %v2337_v8 = vpop.f32.mrb[1].mxu1 }
 0x345   :  { %v4752_v44 = vadd.f32 %v2337_v8, %v1387_v62  ;;  %v3423_v37 = vpop.f32.mrb[2].mxu1 }
 0x346   :  { %v4754_v18 = vadd.f32 %v3423_v37, %v3303_v6  ;;  %v2340_v52 = vpop.f32.mrb[3].mxu1  ;;  %v2419_v45 = vsel %vm264_vm0, %v4750_v35, 0.0 }
 0x347   :  { %v4756_v4 = vadd.f32 %v2340_v52, %v1390_v30  ;;  %v2416_v55 = vsel %vm264_vm0, %v4752_v44, 0.0 }
 0x348   :  { %v2421_v36 = vsel %vm264_vm0, %v4754_v18, 0.0 }
 0x349   :  { %v2417_v38 = vsel %vm264_vm0, %v4756_v4, 0.0 }
 0x34a   :  { %v2418_v41 = vadd.f32 %v2417_v38, %v2416_v55 }
 0x34b   :  { %v3426_v57 = vpop.f32.mrb[4].mxu1 }
 0x34c   :  { %v2420_v5 = vadd.f32 %v2419_v45, %v2418_v41  ;;  %v3460_v50 = vadd.f32 %v3426_v57, %v3306_v21  ;;  %v2353_v58 = vpop.f32.mrb[5].mxu1 }
 0x34d   :  { %v3461_v56 = vadd.f32 %v2353_v58, %v1403_v23  ;;  %v3427_v39 = vpop.f32.mrb[6].mxu1 }
 0x34e   :  { %v2422_v51 = vadd.f32 %v2421_v36, %v2420_v5  ;;  %v3462_v1 = vadd.f32 %v3427_v39, %v3307_v34  ;;  %v2356_v28 = vpop.f32.mrb[7].mxu1  ;;  %v2427_v26 = vsel %vm264_vm0, %v3460_v50, 0.0 }
 0x34f   :  { %v2423_v0 = vsel %vm264_vm0, %v3461_v56, 0.0  ;;  %v3463_v10 = vadd.f32 %v2356_v28, %v1406_v9 }
 0x350   :  { %v2424_v31 = vadd.f32 %v2423_v0, %v2422_v51  ;;  %v2429_v2 = vsel %vm264_vm0, %v3462_v1, 0.0 }
 0x351   :  { %v2425_v7 = vsel %vm264_vm0, %v3463_v10, 0.0 }
 0x352   :  { %v2426_v11 = vadd.f32 %v2425_v7, %v2424_v31 }
 0x353   :  { %v3430_v19 = vpop.f32.mrb[8].mxu1 }
 0x354   :  { %v2428_v54 = vadd.f32 %v2427_v26, %v2426_v11  ;;  %v3464_v3 = vadd.f32 %v3430_v19, %v3310_v47  ;;  %v2369_v59 = vpop.f32.mrb[9].mxu1 }
 0x355   :  { %v3465_v27 = vadd.f32 %v2369_v59, %v1419_v48  ;;  %v3431_v13 = vpop.f32.mrb[10].mxu1 }
 0x356   :  { %v2430_v60 = vadd.f32 %v2429_v2, %v2428_v54  ;;  %v3466_v63 = vadd.f32 %v3431_v13, %v3311_v53  ;;  %v2372_v40 = vpop.f32.mrb[11].mxu1  ;;  %v2435_v17 = vsel %vm264_vm0, %v3464_v3, 0.0 }
 0x357   :  { %v2431_v46 = vsel %vm264_vm0, %v3465_v27, 0.0  ;;  %v3467_v24 = vadd.f32 %v2372_v40, %v1422_v32 }
 0x358   :  { %v2432_v25 = vadd.f32 %v2431_v46, %v2430_v60  ;;  %v2437_v6 = vsel %vm264_vm0, %v3466_v63, 0.0 }
 0x359   :  { %v2433_v33 = vsel %vm264_vm0, %v3467_v24, 0.0 }
 0x35a   :  { %v2434_v14 = vadd.f32 %v2433_v33, %v2432_v25 }
 0x35b   :  { %v3434_v49 = vpop.f32.mrb[12].mxu1 }
 0x35c   :  { %v2436_v61 = vadd.f32 %v2435_v17, %v2434_v14  ;;  %v3468_v43 = vadd.f32 %v3434_v49, %v3314_v22  ;;  %v2385_v62 = vpop.f32.mrb[13].mxu1 }
 0x35d   :  { %v3469_v30 = vadd.f32 %v2385_v62, %v1435_v42  ;;  %v3435_v21 = vpop.f32.mrb[14].mxu1 }
 0x35e   :  { %v2438_v23 = vadd.f32 %v2437_v6, %v2436_v61  ;;  %v3470_v34 = vadd.f32 %v3435_v21, %v3315_v12  ;;  %v2388_v9 = vpop.f32.mrb[15].mxu1  ;;  %v2443_v29 = vsel %vm264_vm0, %v3468_v43, 0.0 }
 0x35f   :  { %v2439_v47 = vsel %vm264_vm0, %v3469_v30, 0.0  ;;  %v3471_v48 = vadd.f32 %v2388_v9, %v1438_v16 }
 0x360   :  { %v2440_v53 = vadd.f32 %v2439_v47, %v2438_v23  ;;  %v2445_v22 = vsel %vm264_vm0, %v3470_v34, 0.0 }
 0x361   :  { %v2441_v32 = vsel %vm264_vm0, %v3471_v48, 0.0 }
 0x362   :  { %v2442_v20 = vadd.f32 %v2441_v32, %v2440_v53 }
 0x364   :  { %v2444_v15 = vadd.f32 %v2443_v29, %v2442_v20 }
 0x366   :  { %v2446_v8 = vadd.f32 %v2445_v22, %v2444_v15 }
 0x368   :  { %v2447_v37 = vrot.slane %v2446_v8, 4 }
 0x36a   :  { %v2448_v52 = vadd.f32 %v2447_v37, %v2446_v8 }
 0x36c   :  { %v2449_v42 = vrot.slane %v2448_v52, 2 }
 0x36e   :  { %v2450_v55 = vadd.f32 %v2449_v42, %v2448_v52 }
 0x370   :  { %v2451_v38 = vrot.slane %v2450_v55, 1 }
 0x372   :  { %v2452_v12 = vadd.f32 %v2451_v38, %v2450_v55 }
 0x374   :  { %v2453_v41 = vmul.f32 0.0078125, %v2452_v12 }
 0x376   :  { %v4779_v45 = vsub.f32 %v4752_v44, %v2453_v41  ;;  %v4782_v16 = vsub.f32 %v4756_v4, %v2453_v41  ;;  %v4785_v57 = vsub.f32 %v4750_v35, %v2453_v41  ;;  %v4788_v5 = vsub.f32 %v4754_v18, %v2453_v41 }
 0x377   :  { %v4790_v58 = vsub.f32 %v3461_v56, %v2453_v41  ;;  %v4792_v36 = vsub.f32 %v3463_v10, %v2453_v41  ;;  %v4794_v39 = vsub.f32 %v3460_v50, %v2453_v41  ;;  %v4796_v51 = vsub.f32 %v3462_v1, %v2453_v41 }
 0x378   :  { %v4798_v28 = vsub.f32 %v3465_v27, %v2453_v41  ;;  %v4800_v44 = vsub.f32 %v3467_v24, %v2453_v41  ;;  %v4802_v4 = vsub.f32 %v3464_v3, %v2453_v41  ;;  %v4804_v0 = vsub.f32 %v3466_v63, %v2453_v41 }
 0x379   :  { %v2466_v35 = vsub.f32 %v3469_v30, %v2453_v41  ;;  %v2467_v31 = vsub.f32 %v3471_v48, %v2453_v41  ;;  %v4806_v18 = vsub.f32 %v3468_v43, %v2453_v41  ;;  %v4808_v56 = vsub.f32 %v3470_v34, %v2453_v41 }
 0x37a   :  { %v2470_v50 = vmul.f32 %v4779_v45, %v4779_v45  ;;  %v2471_v1 = vmul.f32 %v4782_v16, %v4782_v16  ;;  %v2472_v10 = vmul.f32 %v4785_v57, %v4785_v57  ;;  %v2473_v7 = vmul.f32 %v4788_v5, %v4788_v5 }
 0x37b   :  { %v2474_v54 = vmul.f32 %v4790_v58, %v4790_v58  ;;  %v2475_v2 = vmul.f32 %v4792_v36, %v4792_v36  ;;  %v2476_v60 = vmul.f32 %v4794_v39, %v4794_v39  ;;  %v2477_v46 = vmul.f32 %v4796_v51, %v4796_v51 }
 0x37c   :  { %v2486_v11 = vsel %vm264_vm0, %v2470_v50, 0.0  ;;  %v2487_v26 = vsel %vm264_vm0, %v2471_v1, 0.0  ;;  %v2489_v3 = vsel %vm264_vm0, %v2472_v10, 0.0  ;;  %v2491_v27 = vsel %vm264_vm0, %v2473_v7, 0.0 }
 0x37d   :  { %v2488_v19 = vadd.f32 %v2487_v26, %v2486_v11  ;;  %v2493_v63 = vsel %vm264_vm0, %v2474_v54, 0.0  ;;  %v2495_v24 = vsel %vm264_vm0, %v2475_v2, 0.0  ;;  %v2478_v33 = vmul.f32 %v4798_v28, %v4798_v28 }
 0x37e   :  { %v2497_v14 = vsel %vm264_vm0, %v2476_v60, 0.0  ;;  %v2479_v49 = vmul.f32 %v4800_v44, %v4800_v44  ;;  %v2499_v61 = vsel %vm264_vm0, %v2477_v46, 0.0  ;;  %v2480_v62 = vmul.f32 %v4802_v4, %v4802_v4 }
 0x37f   :  { %v2490_v59 = vadd.f32 %v2489_v3, %v2488_v19  ;;  %v2501_v6 = vsel %vm264_vm0, %v2478_v33, 0.0  ;;  %v2481_v21 = vmul.f32 %v4804_v0, %v4804_v0  ;;  %v2482_v9 = vmul.f32 %v2466_v35, %v2466_v35 }
 0x380   :  { %v2503_v23 = vsel %vm264_vm0, %v2479_v49, 0.0  ;;  %v2505_v47 = vsel %vm264_vm0, %v2480_v62, 0.0  ;;  %v2483_v53 = vmul.f32 %v2467_v31, %v2467_v31  ;;  %v2484_v29 = vmul.f32 %v4806_v18, %v4806_v18 }
 0x381   :  { %v2492_v13 = vadd.f32 %v2491_v27, %v2490_v59  ;;  %v2507_v32 = vsel %vm264_vm0, %v2481_v21, 0.0  ;;  %v2509_v15 = vsel %vm264_vm0, %v2482_v9, 0.0  ;;  %v2485_v8 = vmul.f32 %v4808_v56, %v4808_v56 }
 0x382   :  { %v2511_v37 = vsel %vm264_vm0, %v2483_v53, 0.0  ;;  %v2513_v42 = vsel %vm264_vm0, %v2484_v29, 0.0 }
 0x383   :  { %v2494_v40 = vadd.f32 %v2493_v63, %v2492_v13  ;;  %v2515_v38 = vsel %vm264_vm0, %v2485_v8, 0.0 }
 0x385   :  { %v2496_v25 = vadd.f32 %v2495_v24, %v2494_v40 }
 0x387   :  { %v2498_v17 = vadd.f32 %v2497_v14, %v2496_v25 }
 0x389   :  { %v2500_v43 = vadd.f32 %v2499_v61, %v2498_v17 }
 0x38b   :  { %v2502_v30 = vadd.f32 %v2501_v6, %v2500_v43 }
 0x38d   :  { %v2504_v34 = vadd.f32 %v2503_v23, %v2502_v30 }
 0x38f   :  { %v2506_v48 = vadd.f32 %v2505_v47, %v2504_v34 }
 0x391   :  { %v2508_v20 = vadd.f32 %v2507_v32, %v2506_v48 }
 0x393   :  { %v2510_v22 = vadd.f32 %v2509_v15, %v2508_v20 }
 0x395   :  { %v2512_v52 = vadd.f32 %v2511_v37, %v2510_v22 }
 0x397   :  { %v2514_v55 = vadd.f32 %v2513_v42, %v2512_v52 }
 0x399   :  { %v2516_v12 = vadd.f32 %v2515_v38, %v2514_v55 }
 0x39b   :  { %v2517_v41 = vrot.slane %v2516_v12, 4 }
 0x39d   :  { %v2518_v50 = vadd.f32 %v2517_v41, %v2516_v12 }
 0x39f   :  { %v2519_v1 = vrot.slane %v2518_v50, 2 }
 0x3a1   :  { %v2520_v10 = vadd.f32 %v2519_v1, %v2518_v50 }
 0x3a3   :  { %v2521_v7 = vrot.slane %v2520_v10, 1 }
 0x3a5   :  { %v2522_v11 = vadd.f32 %v2521_v7, %v2520_v10 }
 0x3a7   :  { %v2523_v26 = vmul.f32 0.0078125, %v2522_v11 }
 0x3a9   :  { %v2524_v19 = vadd.f32 1e-05, %v2523_v26 }
 0x3ab   :  { %3623 = vrsqrt.f32 %v2524_v19 }
 0x3b5   :  { %v3624_v54 = vpop.eup %3623 }
 0x3b6   :  { %v2538_v3 = vmul.f32 %v3624_v54, %v2466_v35  ;;  %v2539_v59 = vmul.f32 %v3624_v54, %v2467_v31  ;;  %v2526_v2 = vmul.f32 %v3624_v54, %v4779_v45  ;;  %v2527_v27 = vmul.f32 %v3624_v54, %v4782_v16 }
 0x3b7   :  { %v2528_v13 = vmul.f32 %v3624_v54, %v4785_v57  ;;  %v2529_v60 = vmul.f32 %v3624_v54, %v4788_v5  ;;  %v2530_v63 = vmul.f32 %v3624_v54, %v4790_v58  ;;  %v2531_v40 = vmul.f32 %v3624_v54, %v4792_v36 }
 0x3b8   :  { %v2554_v46 = vmax.f32 %v2538_v3, 0.0  ;;  %v2555_v24 = vmax.f32 %v2539_v59, 0.0  ;;  %v2542_v25 = vmax.f32 %v2526_v2, 0.0  ;;  %v2543_v33 = vmax.f32 %v2527_v27, 0.0 }
 0x3b9   :  { %v2544_v14 = vmax.f32 %v2528_v13, 0.0  ;;  %v2545_v17 = vmax.f32 %v2529_v60, 0.0  ;;  %v2546_v35 = vmax.f32 %v2530_v63, 0.0  ;;  %v2547_v31 = vmax.f32 %v2531_v40, 0.0 }
 0x3ba   :  { %v2564_v49 = vpack.c.bf16 %v2555_v24, %v2554_v46  ;;  %v2558_v45 = vpack.c.bf16 %v2543_v33, %v2542_v25  ;;  %v2532_v16 = vmul.f32 %v3624_v54, %v4794_v39  ;;  %v2533_v57 = vmul.f32 %v3624_v54, %v4796_v51 }
 0x3bb   :  { %v2559_v61 = vpack.c.bf16 %v2545_v17, %v2544_v14  ;;  %v2560_v5 = vpack.c.bf16 %v2547_v31, %v2546_v35  ;;  %v2534_v58 = vmul.f32 %v3624_v54, %v4798_v28  ;;  %v2535_v36 = vmul.f32 %v3624_v54, %v4800_v44 }
 0x3bc   :  { %3440 = vmatprep.mubr.msk.bf16.mxu0 %vm264_vm0, %v2558_v45  ;;  %v2548_v43 = vmax.f32 %v2532_v16, 0.0  ;;  %v2549_v62 = vmax.f32 %v2533_v57, 0.0  ;;  %v2536_v6 = vmul.f32 %v3624_v54, %v4802_v4  ;;  %v2537_v30 = vmul.f32 %v3624_v54, %v4804_v0 }
 0x3bd   :  { %3441 = vmatmul.mubr.msk.bf16.vlgmr.msra.gmra.mrb[32].mxu0 %vm264_vm0, %v2559_v61  ;;  %v2550_v21 = vmax.f32 %v2534_v58, 0.0  ;;  %v2551_v39 = vmax.f32 %v2535_v36, 0.0  ;;  %v2540_v51 = vmul.f32 %v3624_v54, %v4806_v18  ;;  %v2541_v23 = vmul.f32 %v3624_v54, %v4808_v56 }
 0x3be   :  { %3444 = vmatprep.mubr.msk.bf16.mxu0 %vm264_vm0, %v2560_v5  ;;  %v2561_v28 = vpack.c.bf16 %v2549_v62, %v2548_v43  ;;  %v2552_v44 = vmax.f32 %v2536_v6, 0.0  ;;  %v2553_v34 = vmax.f32 %v2537_v30, 0.0 }
 0x3bf   :  { %v2562_v9 = vpack.c.bf16 %v2551_v39, %v2550_v21  ;;  %v2556_v47 = vmax.f32 %v2540_v51, 0.0  ;;  %v2557_v48 = vmax.f32 %v2541_v23, 0.0 }
 0x3c0   :  { %v2563_v53 = vpack.c.bf16 %v2553_v34, %v2552_v44 }
 0x3c1   :  { %v2565_v4 = vpack.c.bf16 %v2557_v48, %v2556_v47 }
 0x3c5   :  { %3445 = vmatmul.mubr.msk.bf16.gmra.mrb[36].mxu0 %vm264_vm0, %v2561_v28 }
 0x3c6   :  { %3448 = vmatprep.mubr.msk.bf16.mxu0 %vm264_vm0, %v2562_v9 }
 0x3cd   :  { %3449 = vmatmul.mubr.msk.bf16.gmra.mrb[40].mxu0 %vm264_vm0, %v2563_v53 }
 0x3ce   :  { %3452 = vmatprep.mubr.msk.bf16.mxu0 %vm264_vm0, %v2564_v49 }
 0x3d5   :  { %3453 = vmatmul.mubr.msk.bf16.gmra.mrb[44].mxu0 %vm264_vm0, %v2565_v4 }
 0x490   :  { %v3442_v0 = vpop.f32.mrb[32].mxu0 }
 0x491   :  { %v2640_v18 = vpop.f32.mrb[33].mxu0 }
 0x492   :  { %v3443_v56 = vpop.f32.mrb[34].mxu0 }
 0x493   :  { %v2643_v32 = vpop.f32.mrb[35].mxu0 }
 0x494   :  { %v2703_v20 = vadd.f32 %v2643_v32, %v2640_v18 }
 0x496   :  { %v2704_v29 = vadd.f32 %v3442_v0, %v2703_v20 }
 0x498   :  { %v3446_v15 = vpop.f32.mrb[36].mxu0  ;;  %v2705_v22 = vadd.f32 %v3443_v56, %v2704_v29 }
 0x499   :  { %v2656_v8 = vpop.f32.mrb[37].mxu0 }
 0x49a   :  { %v2706_v37 = vadd.f32 %v2705_v22, %v2656_v8  ;;  %v3447_v52 = vpop.f32.mrb[38].mxu0 }
 0x49b   :  { %v2659_v42 = vpop.f32.mrb[39].mxu0 }
 0x49c   :  { %v2707_v55 = vadd.f32 %v2706_v37, %v2659_v42 }
 0x49e   :  { %v2708_v38 = vadd.f32 %v3446_v15, %v2707_v55 }
 0x4a0   :  { %v3450_v12 = vpop.f32.mrb[40].mxu0  ;;  %v2709_v41 = vadd.f32 %v3447_v52, %v2708_v38 }
 0x4a1   :  { %v2672_v50 = vpop.f32.mrb[41].mxu0 }
 0x4a2   :  { %v2710_v1 = vadd.f32 %v2709_v41, %v2672_v50  ;;  %v3451_v10 = vpop.f32.mrb[42].mxu0 }
 0x4a3   :  { %v2675_v7 = vpop.f32.mrb[43].mxu0 }
 0x4a4   :  { %v2711_v11 = vadd.f32 %v2710_v1, %v2675_v7 }
 0x4a6   :  { %v2712_v26 = vadd.f32 %v3450_v12, %v2711_v11 }
 0x4a8   :  { %v3454_v19 = vpop.f32.mrb[44].mxu0  ;;  %v2713_v54 = vadd.f32 %v3451_v10, %v2712_v26 }
 0x4a9   :  { %v2688_v3 = vpop.f32.mrb[45].mxu0 }
 0x4aa   :  { %v2714_v59 = vadd.f32 %v2713_v54, %v2688_v3  ;;  %v3455_v2 = vpop.f32.mrb[46].mxu0 }
 0x4ab   :  { %v2691_v27 = vpop.f32.mrb[47].mxu0 }
 0x4ac   :  { %v2715_v13 = vadd.f32 %v2714_v59, %v2691_v27 }
 0x4ae   :  { %v2716_v60 = vadd.f32 %v3454_v19, %v2715_v13 }
 0x4b0   :  { %v2717_v63 = vadd.f32 %v3455_v2, %v2716_v60 }
 0x4b2   :  { %v2718_v40 = vrot.slane %v2717_v63, 4 }
 0x4b4   :  { %v2719_v46 = vadd.f32 %v2718_v40, %v2717_v63 }
 0x4b6   :  { %v2720_v24 = vrot.slane %v2719_v46, 2 }
 0x4b8   :  { %v2721_v25 = vadd.f32 %v2720_v24, %v2719_v46 }
 0x4ba   :  { %v2722_v33 = vrot.slane %v2721_v25, 1 }
 0x4bc   :  { %v2723_v14 = vadd.f32 %v2722_v33, %v2721_v25 }
 0x4be   :  { %v2724_v17 = vmul.f32 0.0078125, %v2723_v14 }
 0x4c0   :  { %v2725_v35 = vsub.f32 %v2640_v18, %v2724_v17  ;;  %v2726_v31 = vsub.f32 %v2643_v32, %v2724_v17  ;;  %v2727_v49 = vsub.f32 %v3442_v0, %v2724_v17  ;;  %v2728_v45 = vsub.f32 %v3443_v56, %v2724_v17 }
 0x4c1   :  { %v2729_v16 = vsub.f32 %v2656_v8, %v2724_v17  ;;  %v2730_v57 = vsub.f32 %v2659_v42, %v2724_v17  ;;  %v2731_v61 = vsub.f32 %v3446_v15, %v2724_v17  ;;  %v2732_v5 = vsub.f32 %v3447_v52, %v2724_v17 }
 0x4c2   :  { %v2733_v58 = vsub.f32 %v2672_v50, %v2724_v17  ;;  %v2734_v36 = vsub.f32 %v2675_v7, %v2724_v17  ;;  %v2735_v43 = vsub.f32 %v3450_v12, %v2724_v17  ;;  %v2736_v62 = vsub.f32 %v3451_v10, %v2724_v17 }
 0x4c3   :  { %v2737_v6 = vsub.f32 %v2688_v3, %v2724_v17  ;;  %v2738_v30 = vsub.f32 %v2691_v27, %v2724_v17  ;;  %v2739_v21 = vsub.f32 %v3454_v19, %v2724_v17  ;;  %v2740_v39 = vsub.f32 %v3455_v2, %v2724_v17 }
 0x4c4   :  { %v2741_v51 = vmul.f32 %v2725_v35, %v2725_v35  ;;  %v2742_v23 = vmul.f32 %v2726_v31, %v2726_v31  ;;  %v2743_v28 = vmul.f32 %v2727_v49, %v2727_v49  ;;  %v2744_v34 = vmul.f32 %v2728_v45, %v2728_v45 }
 0x4c5   :  { %v2745_v47 = vmul.f32 %v2729_v16, %v2729_v16  ;;  %v2746_v53 = vmul.f32 %v2730_v57, %v2730_v57  ;;  %v2747_v0 = vmul.f32 %v2731_v61, %v2731_v61  ;;  %v2748_v56 = vmul.f32 %v2732_v5, %v2732_v5 }
 0x4c6   :  { %v2757_v44 = vadd.f32 %v2742_v23, %v2741_v51  ;;  %v2749_v20 = vmul.f32 %v2733_v58, %v2733_v58  ;;  %v2750_v15 = vmul.f32 %v2734_v36, %v2734_v36  ;;  %v2751_v8 = vmul.f32 %v2735_v43, %v2735_v43 }
 0x4c7   :  { %v2752_v52 = vmul.f32 %v2736_v62, %v2736_v62  ;;  %v2753_v55 = vmul.f32 %v2737_v6, %v2737_v6  ;;  %v2754_v12 = vmul.f32 %v2738_v30, %v2738_v30  ;;  %v2755_v50 = vmul.f32 %v2739_v21, %v2739_v21 }
 0x4c8   :  { %v2758_v9 = vadd.f32 %v2757_v44, %v2743_v28  ;;  %v2756_v10 = vmul.f32 %v2740_v39, %v2740_v39 }
 0x4ca   :  { %v2759_v48 = vadd.f32 %v2758_v9, %v2744_v34 }
 0x4cc   :  { %v2760_v4 = vadd.f32 %v2759_v48, %v2745_v47 }
 0x4ce   :  { %v2761_v18 = vadd.f32 %v2760_v4, %v2746_v53  ;;  %v3627_v53 = vld [vmem:[#allocation2] sm:$0xff] }
 0x4d0   :  { %v2762_v32 = vadd.f32 %v2761_v18, %v2747_v0  ;;  %v3628_v0 = vld [vmem:[#allocation2 + $0x8] sm:$0xff] }
 0x4d2   :  { %v2763_v29 = vadd.f32 %v2762_v32, %v2748_v56  ;;  %v3637_v56 = vld [vmem:[#allocation2 + $0x50] sm:$0xff] }
 0x4d4   :  { %v2764_v22 = vadd.f32 %v2763_v29, %v2749_v20  ;;  %v3638_v20 = vld [vmem:[#allocation2 + $0x58] sm:$0xff] }
 0x4d6   :  { %v2765_v37 = vadd.f32 %v2764_v22, %v2750_v15  ;;  %v3639_v15 = vld [vmem:[#allocation2 + $0x60] sm:$0xff] }
 0x4d8   :  { %v2766_v42 = vadd.f32 %v2765_v37, %v2751_v8  ;;  %v3640_v8 = vld [vmem:[#allocation2 + $0x68] sm:$0xff] }
 0x4da   :  { %v2767_v38 = vadd.f32 %v2766_v42, %v2752_v52  ;;  %v3641_v52 = vld [vmem:[#allocation2 + $0x70] sm:$0xff] }
 0x4dc   :  { %v2768_v41 = vadd.f32 %v2767_v38, %v2753_v55  ;;  %v3642_v55 = vld [vmem:[#allocation2 + $0x78] sm:$0xff] }
 0x4de   :  { %v2769_v1 = vadd.f32 %v2768_v41, %v2754_v12 }
 0x4e0   :  { %v2770_v7 = vadd.f32 %v2769_v1, %v2755_v50 }
 0x4e2   :  { %v2771_v11 = vadd.f32 %v2770_v7, %v2756_v10 }
 0x4e4   :  { %v2772_v26 = vrot.slane %v2771_v11, 4 }
 0x4e6   :  { %v2773_v19 = vadd.f32 %v2772_v26, %v2771_v11 }
 0x4e8   :  { %v2774_v54 = vrot.slane %v2773_v19, 2 }
 0x4ea   :  { %v2775_v3 = vadd.f32 %v2774_v54, %v2773_v19 }
 0x4ec   :  { %v2776_v59 = vrot.slane %v2775_v3, 1 }
 0x4ee   :  { %v2777_v2 = vadd.f32 %v2776_v59, %v2775_v3 }
 0x4f0   :  { %v2778_v27 = vmul.f32 0.0078125, %v2777_v2 }
 0x4f2   :  { %v2779_v13 = vadd.f32 1e-05, %v2778_v27 }
 0x4f4   :  { %3625 = vrsqrt.f32 %v2779_v13 }
 0x4fe   :  { %v3626_v60 = vpop.eup %3625 }
 0x4ff   :  { %v2781_v63 = vmul.f32 %v3626_v60, %v2725_v35  ;;  %v2782_v40 = vmul.f32 %v3626_v60, %v2726_v31  ;;  %v2783_v46 = vmul.f32 %v3626_v60, %v2727_v49  ;;  %v2784_v24 = vmul.f32 %v3626_v60, %v2728_v45  ;;  %v3629_v35 = vld [vmem:[#allocation2 + $0x10] sm:$0xff]  ;;  %v3630_v49 = vld [vmem:[#allocation2 + $0x18] sm:$0xff] }
 0x500   :  { %v2785_v25 = vmul.f32 %v3626_v60, %v2729_v16  ;;  %v2786_v33 = vmul.f32 %v3626_v60, %v2730_v57  ;;  %v2787_v14 = vmul.f32 %v3626_v60, %v2731_v61  ;;  %v2788_v17 = vmul.f32 %v3626_v60, %v2732_v5  ;;  %v3631_v16 = vld [vmem:[#allocation2 + $0x20] sm:$0xff]  ;;  %v3632_v61 = vld [vmem:[#allocation2 + $0x28] sm:$0xff] }
 0x501   :  { %v2789_v51 = vmul.f32 %v3626_v60, %v2733_v58  ;;  %v2790_v23 = vmul.f32 %v3626_v60, %v2734_v36  ;;  %v2791_v28 = vmul.f32 %v3626_v60, %v2735_v43  ;;  %v2792_v44 = vmul.f32 %v3626_v60, %v2736_v62  ;;  %v3633_v58 = vld [vmem:[#allocation2 + $0x30] sm:$0xff]  ;;  %v3634_v43 = vld [vmem:[#allocation2 + $0x38] sm:$0xff] }
 0x502   :  { %v2793_v34 = vmul.f32 %v3626_v60, %v2737_v6  ;;  %v2794_v9 = vmul.f32 %v3626_v60, %v2738_v30  ;;  %v2795_v47 = vmul.f32 %v3626_v60, %v2739_v21  ;;  %v2796_v48 = vmul.f32 %v3626_v60, %v2740_v39  ;;  %v3635_v6 = vld [vmem:[#allocation2 + $0x40] sm:$0xff]  ;;  %v3636_v21 = vld [vmem:[#allocation2 + $0x48] sm:$0xff] }
 0x503   :  { %v2797_v4 = vadd.f32 %v3627_v53, %v2781_v63  ;;  %v2798_v18 = vadd.f32 %v3628_v0, %v2782_v40  ;;  %v2799_v31 = vadd.f32 %v3629_v35, %v2783_v46  ;;  %v2800_v45 = vadd.f32 %v3630_v49, %v2784_v24 }
 0x504   :  { %v2801_v57 = vadd.f32 %v3631_v16, %v2785_v25  ;;  %v2802_v5 = vadd.f32 %v3632_v61, %v2786_v33  ;;  %v2803_v36 = vadd.f32 %v3633_v58, %v2787_v14  ;;  %v2804_v62 = vadd.f32 %v3634_v43, %v2788_v17 }
 0x505   :  { %v2805_v30 = vadd.f32 %v3635_v6, %v2789_v51  ;;  %v2806_v39 = vadd.f32 %v3636_v21, %v2790_v23  ;;  %v2807_v32 = vadd.f32 %v3637_v56, %v2791_v28  ;;  %v2808_v29 = vadd.f32 %v3638_v20, %v2792_v44 }
 0x506   :  { %v2809_v22 = vadd.f32 %v3639_v15, %v2793_v34  ;;  %v2810_v37 = vadd.f32 %v3640_v8, %v2794_v9  ;;  %v2811_v42 = vadd.f32 %v3641_v52, %v2795_v47  ;;  %v2812_v38 = vadd.f32 %v3642_v55, %v2796_v48 }
 0x507   :  { %v2813_v12 = vmax.f32 %v2797_v4, 0.0  ;;  %v2814_v41 = vmax.f32 %v2798_v18, 0.0  ;;  %v2815_v50 = vmax.f32 %v2799_v31, 0.0  ;;  %v2816_v1 = vmax.f32 %v2800_v45, 0.0 }
 0x508   :  { %v2817_v10 = vmax.f32 %v2801_v57, 0.0  ;;  %v2818_v7 = vmax.f32 %v2802_v5, 0.0  ;;  %v2819_v11 = vmax.f32 %v2803_v36, 0.0  ;;  %v2820_v26 = vmax.f32 %v2804_v62, 0.0 }
 0x509   :  { %v2821_v19 = vmax.f32 %v2805_v30, 0.0  ;;  %v2822_v54 = vmax.f32 %v2806_v39, 0.0  ;;  %v2823_v3 = vmax.f32 %v2807_v32, 0.0  ;;  %v2824_v59 = vmax.f32 %v2808_v29, 0.0  ;;  %2829 = vst [vmem:[#allocation8] sm:$0xff] %v2813_v12  ;;  %2830 = vst [vmem:[#allocation8 + $0x8] sm:$0xff] %v2814_v41 }
 0x50a   :  { %2831 = vst [vmem:[#allocation8 + $0x10] sm:$0xff] %v2815_v50  ;;  %2832 = vst [vmem:[#allocation8 + $0x18] sm:$0xff] %v2816_v1  ;;  %v2825_v2 = vmax.f32 %v2809_v22, 0.0  ;;  %v2826_v27 = vmax.f32 %v2810_v37, 0.0  ;;  %v2827_v13 = vmax.f32 %v2811_v42, 0.0  ;;  %v2828_v60 = vmax.f32 %v2812_v38, 0.0 }
 0x50b   :  { %2833 = vst [vmem:[#allocation8 + $0x20] sm:$0xff] %v2817_v10  ;;  %2834 = vst [vmem:[#allocation8 + $0x28] sm:$0xff] %v2818_v7 }
 0x50c   :  { %2835 = vst [vmem:[#allocation8 + $0x30] sm:$0xff] %v2819_v11  ;;  %2836 = vst [vmem:[#allocation8 + $0x38] sm:$0xff] %v2820_v26 }
 0x50d   :  { %2837 = vst [vmem:[#allocation8 + $0x40] sm:$0xff] %v2821_v19  ;;  %2838 = vst [vmem:[#allocation8 + $0x48] sm:$0xff] %v2822_v54 }
 0x50e   :  { %2839 = vst [vmem:[#allocation8 + $0x50] sm:$0xff] %v2823_v3  ;;  %2840 = vst [vmem:[#allocation8 + $0x58] sm:$0xff] %v2824_v59 }
 0x50f   :  { %2841 = vst [vmem:[#allocation8 + $0x60] sm:$0xff] %v2825_v2  ;;  %2842 = vst [vmem:[#allocation8 + $0x68] sm:$0xff] %v2826_v27 }
 0x510   :  { %2843 = vst [vmem:[#allocation8 + $0x70] sm:$0xff] %v2827_v13  ;;  %2844 = vst [vmem:[#allocation8 + $0x78] sm:$0xff] %v2828_v60 }
 0x511   :  { %3720 = shalt.err (!%p3717_p0)
}
 0x512   :  { %s3721_s21 = scalar_lea.hbm %s4896_s5, 2048 }
 0x513   :  { %p3722_p1 = scmp.ne.s32.totalorder %s4896_s5, %s3721_s21  ;;  %p3725_p2 = scmp.lt.u32.totalorder %s3721_s21, %s4896_s5 }
 0x515   :  { %p3727_p3 = pnand %p3725_p2, %p3722_p1 }
 0x517   :  { %3730 = shalt.err (!%p3727_p3)
}
 0x518   :  { %2856 = dma.vmem_to_hbm [thread:$0]  %s2851_s26, 2048, %s4896_s5, [#allocation4], %s3739_s30, %s3739_s30, %s3740_s6  }
 0x519   :  { %3735 = dma.done.wait [#allocation4], 2048  }
 0x51a   :  { %3736 = vsyncadd [#allocation4], 4294965248 }
 0x51b   :  { %2860 = vsyncpa [#allocation3], 1 }
 0x51c   :  { %2861 = vsyncpa [#allocation6], 1 }
 0x51d   :  { %2862 = vsyncpa [#allocation4], 1 }

</bundles_post_ra>
